<compile_context>
chip_gen: v7x
topology: tpu7x:2x2x1
jax: 0.10.0
libtpu: 0.0.40
codegen_flags: <defaults>
</compile_context>

<pallas_src>
import numpy as np
import jax
import jax.numpy as jnp
from jax.experimental import pallas as pl
from jax.experimental.pallas import tpu as pltpu

_G = 4  # number of VQC gate circuits (forget, input, update, output)


# ----------------------------------------------------------------------------------
# Kernel
# ----------------------------------------------------------------------------------
def _make_kernel(B, H, N, rw_len):
    f32 = jnp.float32

    # Hillis-Steele shift amounts for the in-lane prefix product (log2(N) steps).
    shifts = []
    k = 1
    while k < N:
        shifts.append(k)
        k *= 2

    def kernel(latent_ref, x0_ref, gum_ref,
               w_int_ref, b_int_ref, w_hup_ref, b_hup_ref, w_cup_ref, b_cup_ref,
               w_cx_ref, w_ch_ref, b_cell_ref,
               cw_ref, sw_ref, pos0_ref,
               w_cl_ref, b_cl_ref, w_up_ref, b_up_ref, w_down_ref,
               out_ref):
        # ---- loop-invariant loads / broadcasts hoisted out of the recurrence ----------
        w_cx = w_cx_ref[...]
        w_ch = w_ch_ref[...]
        w_cl = w_cl_ref[...]                       # shared (N, H) clayer_out weight
        w_up = w_up_ref[...]                       # already scaled by 1/temp host-side
        w_down = w_down_ref[...]

        b_cell_b = jnp.broadcast_to(b_cell_ref[...], (B, N))
        b_cl_b = jnp.broadcast_to(b_cl_ref[...], (B, H))
        b_up_b = jnp.broadcast_to(b_up_ref[...], (B, N))     # already scaled by 1/temp
        pos0_b = jnp.broadcast_to(pos0_ref[...], (B, N))     # 1.0 at lane 0
        inv_pos0_b = 1.0 - pos0_b
        cw_b = [jnp.broadcast_to(cw_ref[g], (B, N)) for g in range(_G)]  # cos(wq_g)
        sw_b = [jnp.broadcast_to(sw_ref[g], (B, N)) for g in range(_G)]  # sin(wq_g) (0 for RY)
        ones_k = [jnp.ones((B, k_), f32) for k_ in shifts]    # hoisted scan fill blocks

        def vqc(z):
            # Closed-form <Z_i> of AngleEmbedding + 1-layer BasicEntanglerLayers + CNOT ring:
            #   <Z_0> = prod_{i>=1} z_i ,  <Z_j> = prod_{i<=j} z_i  (j >= 1)
            # Prefix products via a log2(N) shift/mask scan: the "roll by k" is a static
            # lane slice + concat with ones (VPU/XLU only -- no MXU on the critical chain).
            p = z * inv_pos0_b + pos0_b            # [1, z1, ..., z_{N-1}]
            for s, k_ in enumerate(shifts):
                shifted = jnp.concatenate([ones_k[s], p[:, :N - k_]], axis=1)
                p = p * shifted                    # p[j] = prod_{1..j} z
            # lane 0 <- last prefix; lanes 1..N-1 <- z0 * prefix_j
            return pos0_b * p[:, N - 1:N] + inv_pos0_b * (z[:, 0:1] * p)

        # ---- initial hidden / cell state -----------------------------------------------
        inter = jnp.tanh(jnp.dot(latent_ref[...], w_int_ref[...],
                                 preferred_element_type=f32) + b_int_ref[...])
        h = jnp.tanh(jnp.dot(inter, w_hup_ref[...],
                             preferred_element_type=f32) + b_hup_ref[...])
        c = jnp.tanh(jnp.dot(inter, w_cup_ref[...],
                             preferred_element_type=f32) + b_cup_ref[...])
        x = x0_ref[...]

        ys = []
        # TODO(synk): for rw_len >~ 16 switch to lax.fori_loop carrying (x, h, c) (or step t
        #             through an "arbitrary" grid axis) to bound vreg live ranges.
        for t in range(rw_len):
            # cell.weight split host-side -> no [x | h] lane concat per step
            gates = (jnp.dot(x, w_cx, preferred_element_type=f32)
                     + jnp.dot(h, w_ch, preferred_element_type=f32) + b_cell_b)   # (B, N)
            cg = jnp.cos(gates)
            sg = jnp.sin(gates)
            # local <Z> before the CNOT ring:
            #   RX entangler: cos(g + w) = cos g cos w - sin g sin w
            #   RY entangler ('input' circuit): cos(w) * cos(g)  (its sin entry is 0)
            ev = [vqc(cg * cw_b[g] - sg * sw_b[g]) for g in range(_G)]
            # shared clayer_out weight, one small matmul per circuit (independent, not chained)
            act = [jnp.dot(ev[g], w_cl, preferred_element_type=f32) + b_cl_b
                   for g in range(_G)]
            ingate = jax.nn.sigmoid(act[0])        # forget-circuit (torch naming swap)
            forgetgate = jax.nn.sigmoid(act[1])    # input-circuit
            cellgate = jnp.tanh(act[2])            # update-circuit
            outgate = jax.nn.sigmoid(act[3])       # output-circuit

            c = c * forgetgate + ingate * cellgate
            h = outgate * jnp.tanh(c)

            # hard gumbel-softmax over the node axis; gumbel noise and 1/temp were folded
            # into gum / w_up / b_up host-side.
            logits = jnp.dot(h, w_up, preferred_element_type=f32) + b_up_b + gum_ref[t]
            m = jnp.max(logits, axis=1, keepdims=True)
            sh = logits - m
            e = jnp.exp(sh)
            # approx reciprocal: the straight-through forward value is ~y_hard, so the soft
            # softmax accuracy does not affect the output beyond ~1 ulp.
            y_soft = e * pl.reciprocal(jnp.sum(e, axis=1, keepdims=True), approx=True)
            # argmax(logits) == argmax(softmax): reuse the logits max (ties -> multi-hot,
            # same as the torch max(...).eq(...) formulation, probability ~0).
            y_hard = (sh == 0.0).astype(f32)
            y = (y_hard - y_soft) + y_soft         # straight-through estimator forward value
            ys.append(y)

            x = jnp.dot(y, w_down, preferred_element_type=f32)

        out_ref[...] = jnp.stack(ys, axis=0)       # single store at the end

    return kernel


# ----------------------------------------------------------------------------------
# Wrapper
# ----------------------------------------------------------------------------------
def qgenerator_forward(latent, inputs0, u_noise, params, *, temp, rw_len):
    B = latent.shape[0]
    H = params["w_int"].shape[1]
    N = params["w_up"].shape[1]
    H_in = params["w_down"].shape[1]
    f32 = jnp.float32
    inv_temp = np.float32(1.0 / float(temp))
    eps = 1e-20

    # ---- host-side, loop-invariant transforms of parameters / noise --------------------
    wq = params["wq_all"]                                     # (4, N): forget, input, update, output
    cw = jnp.cos(wq).reshape(_G, 1, N)
    sw = jnp.sin(wq).at[1].set(0.0).reshape(_G, 1, N)         # RY entangler: no sin term
    pos0 = jnp.zeros((1, N), f32).at[0, 0].set(1.0)

    w_cell = params["w_cell"]                                 # (H_in + H, N)
    w_cx = w_cell[:H_in]
    w_ch = w_cell[H_in:]

    w_up_s = params["w_up"] * inv_temp                        # fold 1/temp into the projection
    b_up_s = params["b_up"] * inv_temp
    gum = (-jnp.log(-jnp.log(u_noise + eps) + eps)) * inv_temp  # (rw_len, B, N)

    inputs = [latent, inputs0, gum,
              params["w_int"], params["b_int"], params["w_hup"], params["b_hup"],
              params["w_cup"], params["b_cup"],
              w_cx, w_ch, params["b_cell"],
              cw, sw, pos0,
              params["w_cl"], params["b_cl"], w_up_s, b_up_s, params["w_down"]]

    def full_spec(arr):
        nd = arr.ndim
        return pl.BlockSpec(arr.shape, lambda i, _nd=nd: (0,) * _nd)

    out = pl.pallas_call(
        _make_kernel(B, H, N, rw_len),
        out_shape=jax.ShapeDtypeStruct((rw_len, B, N), f32),
        grid=(1,),
        in_specs=[full_spec(a) for a in inputs],
        out_specs=pl.BlockSpec((rw_len, B, N), lambda i: (0, 0, 0)),
        compiler_params=pltpu.CompilerParams(dimension_semantics=("arbitrary",)),
    )(*inputs)

    return jnp.transpose(out, (1, 0, 2))   # (B, rw_len, N), matches torch.stack(out, dim=1)


# ----------------------------------------------------------------------------------
# Deterministic parameter init (shapes follow QGenerator.__init__ / QLSTMCell.__init__)
# ----------------------------------------------------------------------------------
def init_params(key, *, H_inputs, H, z_dim, N):
    ks = jax.random.split(key, 16)

    def xavier(k, fan_in, fan_out):
        a = np.sqrt(6.0 / (fan_in + fan_out))
        return jax.random.uniform(k, (fan_in, fan_out), jnp.float32, -a, a)

    def torch_default(k, fan_in, fan_out):
        b = 1.0 / np.sqrt(fan_in)
        return jax.random.uniform(k, (fan_in, fan_out), jnp.float32, -b, b)

    two_pi = 2.0 * np.pi
    return {
        "w_int": xavier(ks[0], z_dim, H), "b_int": jnp.zeros((1, H), jnp.float32),
        "w_hup": xavier(ks[1], H, H), "b_hup": jnp.zeros((1, H), jnp.float32),
        "w_cup": xavier(ks[2], H, H), "b_cup": jnp.zeros((1, H), jnp.float32),
        "w_cell": xavier(ks[3], H_inputs + H, N),        # QLSTMCell.cell (pre-transposed)
        "b_cell": jnp.zeros((1, N), jnp.float32),
        "wq_all": jax.random.uniform(ks[4], (4, N), jnp.float32, 0.0, two_pi),
        "w_cl": torch_default(ks[8], N, H),
        "b_cl": jax.random.uniform(ks[9], (1, H), jnp.float32,
                                   -1.0 / np.sqrt(N), 1.0 / np.sqrt(N)),
        "w_up": torch_default(ks[10], H, N),
        "b_up": jax.random.uniform(ks[11], (1, N), jnp.float32,
                                   -1.0 / np.sqrt(H), 1.0 / np.sqrt(H)),
        "w_down": torch_default(ks[12], N, H_inputs),    # no bias
    }


# ----------------------------------------------------------------------------------
# Pure-JAX reference (same math, faithful op order) used to validate the kernel
# ----------------------------------------------------------------------------------
def reference_forward(latent, inputs0, u_noise, p, *, temp, rw_len):
    def vqc(z):
        cum = jnp.cumprod(z, axis=1)
        tail = jnp.prod(z[:, 1:], axis=1, keepdims=True)
        return jnp.concatenate([tail, cum[:, 1:]], axis=1)

    wq_f, wq_i, wq_u, wq_o = (p["wq_all"][k:k + 1] for k in range(4))
    inter = jnp.tanh(latent @ p["w_int"] + p["b_int"])
    h = jnp.tanh(inter @ p["w_hup"] + p["b_hup"])
    c = jnp.tanh(inter @ p["w_cup"] + p["b_cup"])
    x = inputs0
    outs = []
    for t in range(rw_len):
        gates = jnp.concatenate([x, h], axis=1) @ p["w_cell"] + p["b_cell"]
        ev_f = vqc(jnp.cos(gates + wq_f))
        ev_i = vqc(jnp.cos(wq_i) * jnp.cos(gates))
        ev_u = vqc(jnp.cos(gates + wq_u))
        ev_o = vqc(jnp.cos(gates + wq_o))
        cl = lambda e: e @ p["w_cl"] + p["b_cl"]
        ingate = jax.nn.sigmoid(cl(ev_f))
        forgetgate = jax.nn.sigmoid(cl(ev_i))
        cellgate = jnp.tanh(cl(ev_u))
        outgate = jax.nn.sigmoid(cl(ev_o))
        c = c * forgetgate + ingate * cellgate
        h = outgate * jnp.tanh(c)
        h_up = h @ p["w_up"] + p["b_up"]
        g = -jnp.log(-jnp.log(u_noise[t] + 1e-20) + 1e-20)
        y = jax.nn.softmax((h_up + g) / temp, axis=1)
        y_hard = (y == jnp.max(y, axis=1, keepdims=True)).astype(jnp.float32)
        y = (y_hard - y) + y
        outs.append(y)
        x = y @ p["w_down"]
    return jnp.stack(outs, axis=1)


if __name__ == "__main__":
    # small shapes consistent with the module: H_inputs, H, z_dim, N (nodes/qubits), rw_len, temp
    B, z_dim, H, H_inputs, N, rw_len, temp = 4, 16, 32, 16, 8, 3, 0.5

    key = jax.random.PRNGKey(0)
    k_param, k_latent, k_u = jax.random.split(key, 3)

    params = init_params(k_param, H_inputs=H_inputs, H=H, z_dim=z_dim, N=N)
    latent = jax.random.normal(k_latent, (B, z_dim), jnp.float32)
    inputs0 = jnp.zeros((B, H_inputs), jnp.float32)                 # QGenerator.sample uses zeros
    u_noise = jax.random.uniform(k_u, (rw_len, B, N), jnp.float32)  # torch.rand equivalent

    out = qgenerator_forward(latent, inputs0, u_noise, params, temp=temp, rw_len=rw_len)
    out = jax.block_until_ready(out)

    ref = reference_forward(latent, inputs0, u_noise, params, temp=temp, rw_len=rw_len)
    np.testing.assert_allclose(np.asarray(out), np.asarray(ref), atol=1e-4, rtol=1e-4)
    assert out.shape == (B, rw_len, N)

    print("KERNEL_OK")
</pallas_src>

<mosaic_0001>
module attributes {stable_mosaic.version = 11 : i64} {
  func.func @kernel(%arg0: i32, %arg1: memref<4x16xf32, #tpu.memory_space<vmem>>, %arg2: memref<4x16xf32, #tpu.memory_space<vmem>>, %arg3: memref<3x4x8xf32, #tpu.memory_space<vmem>>, %arg4: memref<16x32xf32, #tpu.memory_space<vmem>>, %arg5: memref<1x32xf32, #tpu.memory_space<vmem>>, %arg6: memref<32x32xf32, #tpu.memory_space<vmem>>, %arg7: memref<1x32xf32, #tpu.memory_space<vmem>>, %arg8: memref<32x32xf32, #tpu.memory_space<vmem>>, %arg9: memref<1x32xf32, #tpu.memory_space<vmem>>, %arg10: memref<16x8xf32, #tpu.memory_space<vmem>>, %arg11: memref<32x8xf32, #tpu.memory_space<vmem>>, %arg12: memref<1x8xf32, #tpu.memory_space<vmem>>, %arg13: memref<4x1x8xf32, #tpu.memory_space<vmem>>, %arg14: memref<4x1x8xf32, #tpu.memory_space<vmem>>, %arg15: memref<1x8xf32, #tpu.memory_space<vmem>>, %arg16: memref<8x32xf32, #tpu.memory_space<vmem>>, %arg17: memref<1x32xf32, #tpu.memory_space<vmem>>, %arg18: memref<32x8xf32, #tpu.memory_space<vmem>>, %arg19: memref<1x8xf32, #tpu.memory_space<vmem>>, %arg20: memref<8x16xf32, #tpu.memory_space<vmem>>, %arg21: memref<3x4x8xf32, #tpu.memory_space<vmem>>) attributes {dimension_semantics = [#tpu.dimension_semantics<arbitrary>], iteration_bounds = array<i64: 1>, scalar_prefetch = 0 : i64, scratch_operands = 0 : i64, tpu.core_type = #tpu.core_type<tc>, window_params = [{pipeline_mode = #tpu.pipeline_mode<synchronous>, transform_indices = @transform_0, window_bounds = array<i64: 4, 16>}, {pipeline_mode = #tpu.pipeline_mode<synchronous>, transform_indices = @transform_1, window_bounds = array<i64: 4, 16>}, {pipeline_mode = #tpu.pipeline_mode<synchronous>, transform_indices = @transform_2, window_bounds = array<i64: 3, 4, 8>}, {pipeline_mode = #tpu.pipeline_mode<synchronous>, transform_indices = @transform_3, window_bounds = array<i64: 16, 32>}, {pipeline_mode = #tpu.pipeline_mode<synchronous>, transform_indices = @transform_4, window_bounds = array<i64: 1, 32>}, {pipeline_mode = #tpu.pipeline_mode<synchronous>, transform_indices = @transform_5, window_bounds = array<i64: 32, 32>}, {pipeline_mode = #tpu.pipeline_mode<synchronous>, transform_indices = @transform_6, window_bounds = array<i64: 1, 32>}, {pipeline_mode = #tpu.pipeline_mode<synchronous>, transform_indices = @transform_7, window_bounds = array<i64: 32, 32>}, {pipeline_mode = #tpu.pipeline_mode<synchronous>, transform_indices = @transform_8, window_bounds = array<i64: 1, 32>}, {pipeline_mode = #tpu.pipeline_mode<synchronous>, transform_indices = @transform_9, window_bounds = array<i64: 16, 8>}, {pipeline_mode = #tpu.pipeline_mode<synchronous>, transform_indices = @transform_10, window_bounds = array<i64: 32, 8>}, {pipeline_mode = #tpu.pipeline_mode<synchronous>, transform_indices = @transform_11, window_bounds = array<i64: 1, 8>}, {pipeline_mode = #tpu.pipeline_mode<synchronous>, transform_indices = @transform_12, window_bounds = array<i64: 4, 1, 8>}, {pipeline_mode = #tpu.pipeline_mode<synchronous>, transform_indices = @transform_13, window_bounds = array<i64: 4, 1, 8>}, {pipeline_mode = #tpu.pipeline_mode<synchronous>, transform_indices = @transform_14, window_bounds = array<i64: 1, 8>}, {pipeline_mode = #tpu.pipeline_mode<synchronous>, transform_indices = @transform_15, window_bounds = array<i64: 8, 32>}, {pipeline_mode = #tpu.pipeline_mode<synchronous>, transform_indices = @transform_16, window_bounds = array<i64: 1, 32>}, {pipeline_mode = #tpu.pipeline_mode<synchronous>, transform_indices = @transform_17, window_bounds = array<i64: 32, 8>}, {pipeline_mode = #tpu.pipeline_mode<synchronous>, transform_indices = @transform_18, window_bounds = array<i64: 1, 8>}, {pipeline_mode = #tpu.pipeline_mode<synchronous>, transform_indices = @transform_19, window_bounds = array<i64: 8, 16>}, {pipeline_mode = #tpu.pipeline_mode<synchronous>, transform_indices = @transform_20, window_bounds = array<i64: 3, 4, 8>}]} {
    %c0 = arith.constant 0 : index
    %c0_0 = arith.constant 0 : index
    %0 = vector.load %arg10[%c0, %c0_0] : memref<16x8xf32, #tpu.memory_space<vmem>>, vector<16x8xf32>
    %c0_1 = arith.constant 0 : index
    %c0_2 = arith.constant 0 : index
    %1 = vector.load %arg11[%c0_1, %c0_2] : memref<32x8xf32, #tpu.memory_space<vmem>>, vector<32x8xf32>
    %c0_3 = arith.constant 0 : index
    %c0_4 = arith.constant 0 : index
    %2 = vector.load %arg16[%c0_3, %c0_4] : memref<8x32xf32, #tpu.memory_space<vmem>>, vector<8x32xf32>
    %c0_5 = arith.constant 0 : index
    %c0_6 = arith.constant 0 : index
    %3 = vector.load %arg18[%c0_5, %c0_6] : memref<32x8xf32, #tpu.memory_space<vmem>>, vector<32x8xf32>
    %c0_7 = arith.constant 0 : index
    %c0_8 = arith.constant 0 : index
    %4 = vector.load %arg20[%c0_7, %c0_8] : memref<8x16xf32, #tpu.memory_space<vmem>>, vector<8x16xf32>
    %c0_9 = arith.constant 0 : index
    %c0_10 = arith.constant 0 : index
    %5 = vector.load %arg12[%c0_9, %c0_10] : memref<1x8xf32, #tpu.memory_space<vmem>>, vector<1x8xf32>
    %6 = vector.shape_cast %5 : vector<1x8xf32> to vector<1x8xf32>
    %7 = vector.broadcast %6 : vector<1x8xf32> to vector<4x8xf32>
    %c0_11 = arith.constant 0 : index
    %c0_12 = arith.constant 0 : index
    %8 = vector.load %arg17[%c0_11, %c0_12] : memref<1x32xf32, #tpu.memory_space<vmem>>, vector<1x32xf32>
    %9 = vector.shape_cast %8 : vector<1x32xf32> to vector<1x32xf32>
    %10 = vector.broadcast %9 : vector<1x32xf32> to vector<4x32xf32>
    %c0_13 = arith.constant 0 : index
    %c0_14 = arith.constant 0 : index
    %11 = vector.load %arg19[%c0_13, %c0_14] : memref<1x8xf32, #tpu.memory_space<vmem>>, vector<1x8xf32>
    %12 = vector.shape_cast %11 : vector<1x8xf32> to vector<1x8xf32>
    %13 = vector.broadcast %12 : vector<1x8xf32> to vector<4x8xf32>
    %c0_15 = arith.constant 0 : index
    %c0_16 = arith.constant 0 : index
    %14 = vector.load %arg15[%c0_15, %c0_16] : memref<1x8xf32, #tpu.memory_space<vmem>>, vector<1x8xf32>
    %15 = vector.shape_cast %14 : vector<1x8xf32> to vector<1x8xf32>
    %16 = vector.broadcast %15 : vector<1x8xf32> to vector<4x8xf32>
    %cst = arith.constant 1.000000e+00 : f32
    %17 = vector.broadcast %cst : f32 to vector<4x8xf32>
    %18 = arith.subf %17, %16 : vector<4x8xf32>
    %c0_17 = arith.constant 0 : index
    %c0_18 = arith.constant 0 : index
    %c0_19 = arith.constant 0 : index
    %19 = vector.load %arg13[%c0_17, %c0_18, %c0_19] : memref<4x1x8xf32, #tpu.memory_space<vmem>>, vector<1x1x8xf32>
    %20 = vector.shape_cast %19 : vector<1x1x8xf32> to vector<1x8xf32>
    %21 = vector.shape_cast %20 : vector<1x8xf32> to vector<1x8xf32>
    %22 = vector.broadcast %21 : vector<1x8xf32> to vector<4x8xf32>
    %c1 = arith.constant 1 : index
    %c0_20 = arith.constant 0 : index
    %c0_21 = arith.constant 0 : index
    %23 = vector.load %arg13[%c1, %c0_20, %c0_21] : memref<4x1x8xf32, #tpu.memory_space<vmem>>, vector<1x1x8xf32>
    %24 = vector.shape_cast %23 : vector<1x1x8xf32> to vector<1x8xf32>
    %25 = vector.shape_cast %24 : vector<1x8xf32> to vector<1x8xf32>
    %26 = vector.broadcast %25 : vector<1x8xf32> to vector<4x8xf32>
    %c2 = arith.constant 2 : index
    %c0_22 = arith.constant 0 : index
    %c0_23 = arith.constant 0 : index
    %27 = vector.load %arg13[%c2, %c0_22, %c0_23] : memref<4x1x8xf32, #tpu.memory_space<vmem>>, vector<1x1x8xf32>
    %28 = vector.shape_cast %27 : vector<1x1x8xf32> to vector<1x8xf32>
    %29 = vector.shape_cast %28 : vector<1x8xf32> to vector<1x8xf32>
    %30 = vector.broadcast %29 : vector<1x8xf32> to vector<4x8xf32>
    %c3 = arith.constant 3 : index
    %c0_24 = arith.constant 0 : index
    %c0_25 = arith.constant 0 : index
    %31 = vector.load %arg13[%c3, %c0_24, %c0_25] : memref<4x1x8xf32, #tpu.memory_space<vmem>>, vector<1x1x8xf32>
    %32 = vector.shape_cast %31 : vector<1x1x8xf32> to vector<1x8xf32>
    %33 = vector.shape_cast %32 : vector<1x8xf32> to vector<1x8xf32>
    %34 = vector.broadcast %33 : vector<1x8xf32> to vector<4x8xf32>
    %c0_26 = arith.constant 0 : index
    %c0_27 = arith.constant 0 : index
    %c0_28 = arith.constant 0 : index
    %35 = vector.load %arg14[%c0_26, %c0_27, %c0_28] : memref<4x1x8xf32, #tpu.memory_space<vmem>>, vector<1x1x8xf32>
    %36 = vector.shape_cast %35 : vector<1x1x8xf32> to vector<1x8xf32>
    %37 = vector.shape_cast %36 : vector<1x8xf32> to vector<1x8xf32>
    %38 = vector.broadcast %37 : vector<1x8xf32> to vector<4x8xf32>
    %c1_29 = arith.constant 1 : index
    %c0_30 = arith.constant 0 : index
    %c0_31 = arith.constant 0 : index
    %39 = vector.load %arg14[%c1_29, %c0_30, %c0_31] : memref<4x1x8xf32, #tpu.memory_space<vmem>>, vector<1x1x8xf32>
    %40 = vector.shape_cast %39 : vector<1x1x8xf32> to vector<1x8xf32>
    %41 = vector.shape_cast %40 : vector<1x8xf32> to vector<1x8xf32>
    %42 = vector.broadcast %41 : vector<1x8xf32> to vector<4x8xf32>
    %c2_32 = arith.constant 2 : index
    %c0_33 = arith.constant 0 : index
    %c0_34 = arith.constant 0 : index
    %43 = vector.load %arg14[%c2_32, %c0_33, %c0_34] : memref<4x1x8xf32, #tpu.memory_space<vmem>>, vector<1x1x8xf32>
    %44 = vector.shape_cast %43 : vector<1x1x8xf32> to vector<1x8xf32>
    %45 = vector.shape_cast %44 : vector<1x8xf32> to vector<1x8xf32>
    %46 = vector.broadcast %45 : vector<1x8xf32> to vector<4x8xf32>
    %c3_35 = arith.constant 3 : index
    %c0_36 = arith.constant 0 : index
    %c0_37 = arith.constant 0 : index
    %47 = vector.load %arg14[%c3_35, %c0_36, %c0_37] : memref<4x1x8xf32, #tpu.memory_space<vmem>>, vector<1x1x8xf32>
    %48 = vector.shape_cast %47 : vector<1x1x8xf32> to vector<1x8xf32>
    %49 = vector.shape_cast %48 : vector<1x8xf32> to vector<1x8xf32>
    %50 = vector.broadcast %49 : vector<1x8xf32> to vector<4x8xf32>
    %cst_38 = arith.constant 1.000000e+00 : f32
    %51 = vector.broadcast %cst_38 : f32 to vector<4x1xf32>
    %cst_39 = arith.constant 1.000000e+00 : f32
    %52 = vector.broadcast %cst_39 : f32 to vector<4x2xf32>
    %cst_40 = arith.constant 1.000000e+00 : f32
    %53 = vector.broadcast %cst_40 : f32 to vector<4x4xf32>
    %c0_41 = arith.constant 0 : index
    %c0_42 = arith.constant 0 : index
    %54 = vector.load %arg1[%c0_41, %c0_42] : memref<4x16xf32, #tpu.memory_space<vmem>>, vector<4x16xf32>
    %c0_43 = arith.constant 0 : index
    %c0_44 = arith.constant 0 : index
    %55 = vector.load %arg4[%c0_43, %c0_44] : memref<16x32xf32, #tpu.memory_space<vmem>>, vector<16x32xf32>
    %cst_45 = arith.constant dense<0.000000e+00> : vector<4x32xf32>
    %56 = tpu.matmul %54, %55, %cst_45 {dimension_numbers = #tpu.dot_dimension_numbers<[1], [0], [0], [1], [0, 0, 1, 1], [], []>} : vector<4x16xf32>, vector<16x32xf32>, vector<4x32xf32> -> vector<4x32xf32>
    %c0_46 = arith.constant 0 : index
    %c0_47 = arith.constant 0 : index
    %57 = vector.load %arg5[%c0_46, %c0_47] : memref<1x32xf32, #tpu.memory_space<vmem>>, vector<1x32xf32>
    %58 = vector.broadcast %57 : vector<1x32xf32> to vector<4x32xf32>
    %59 = arith.addf %56, %58 : vector<4x32xf32>
    %60 = math.tanh %59 : vector<4x32xf32>
    %c0_48 = arith.constant 0 : index
    %c0_49 = arith.constant 0 : index
    %61 = vector.load %arg6[%c0_48, %c0_49] : memref<32x32xf32, #tpu.memory_space<vmem>>, vector<32x32xf32>
    %cst_50 = arith.constant dense<0.000000e+00> : vector<4x32xf32>
    %62 = tpu.matmul %60, %61, %cst_50 {dimension_numbers = #tpu.dot_dimension_numbers<[1], [0], [0], [1], [0, 0, 1, 1], [], []>} : vector<4x32xf32>, vector<32x32xf32>, vector<4x32xf32> -> vector<4x32xf32>
    %c0_51 = arith.constant 0 : index
    %c0_52 = arith.constant 0 : index
    %63 = vector.load %arg7[%c0_51, %c0_52] : memref<1x32xf32, #tpu.memory_space<vmem>>, vector<1x32xf32>
    %64 = vector.broadcast %63 : vector<1x32xf32> to vector<4x32xf32>
    %65 = arith.addf %62, %64 : vector<4x32xf32>
    %66 = math.tanh %65 : vector<4x32xf32>
    %c0_53 = arith.constant 0 : index
    %c0_54 = arith.constant 0 : index
    %67 = vector.load %arg8[%c0_53, %c0_54] : memref<32x32xf32, #tpu.memory_space<vmem>>, vector<32x32xf32>
    %cst_55 = arith.constant dense<0.000000e+00> : vector<4x32xf32>
    %68 = tpu.matmul %60, %67, %cst_55 {dimension_numbers = #tpu.dot_dimension_numbers<[1], [0], [0], [1], [0, 0, 1, 1], [], []>} : vector<4x32xf32>, vector<32x32xf32>, vector<4x32xf32> -> vector<4x32xf32>
    %c0_56 = arith.constant 0 : index
    %c0_57 = arith.constant 0 : index
    %69 = vector.load %arg9[%c0_56, %c0_57] : memref<1x32xf32, #tpu.memory_space<vmem>>, vector<1x32xf32>
    %70 = vector.broadcast %69 : vector<1x32xf32> to vector<4x32xf32>
    %71 = arith.addf %68, %70 : vector<4x32xf32>
    %72 = math.tanh %71 : vector<4x32xf32>
    %c0_58 = arith.constant 0 : index
    %c0_59 = arith.constant 0 : index
    %73 = vector.load %arg2[%c0_58, %c0_59] : memref<4x16xf32, #tpu.memory_space<vmem>>, vector<4x16xf32>
    %cst_60 = arith.constant dense<0.000000e+00> : vector<4x8xf32>
    %74 = tpu.matmul %73, %0, %cst_60 {dimension_numbers = #tpu.dot_dimension_numbers<[1], [0], [0], [1], [0, 0, 1, 1], [], []>} : vector<4x16xf32>, vector<16x8xf32>, vector<4x8xf32> -> vector<4x8xf32>
    %cst_61 = arith.constant dense<0.000000e+00> : vector<4x8xf32>
    %75 = tpu.matmul %66, %1, %cst_61 {dimension_numbers = #tpu.dot_dimension_numbers<[1], [0], [0], [1], [0, 0, 1, 1], [], []>} : vector<4x32xf32>, vector<32x8xf32>, vector<4x8xf32> -> vector<4x8xf32>
    %76 = arith.addf %74, %75 : vector<4x8xf32>
    %77 = arith.addf %76, %7 : vector<4x8xf32>
    %78 = math.cos %77 : vector<4x8xf32>
    %79 = math.sin %77 : vector<4x8xf32>
    %80 = arith.mulf %78, %22 : vector<4x8xf32>
    %81 = arith.mulf %79, %38 : vector<4x8xf32>
    %82 = arith.subf %80, %81 : vector<4x8xf32>
    %83 = arith.mulf %82, %18 : vector<4x8xf32>
    %84 = arith.addf %83, %16 : vector<4x8xf32>
    %85 = vector.extract_strided_slice %84 {offsets = [0, 0], sizes = [4, 7], strides = [1, 1]} : vector<4x8xf32> to vector<4x7xf32>
    %86 = tpu.concatenate %51, %85 in 1 : vector<4x1xf32>, vector<4x7xf32> -> vector<4x8xf32>
    %87 = arith.mulf %84, %86 : vector<4x8xf32>
    %88 = vector.extract_strided_slice %87 {offsets = [0, 0], sizes = [4, 6], strides = [1, 1]} : vector<4x8xf32> to vector<4x6xf32>
    %89 = tpu.concatenate %52, %88 in 1 : vector<4x2xf32>, vector<4x6xf32> -> vector<4x8xf32>
    %90 = arith.mulf %87, %89 : vector<4x8xf32>
    %91 = vector.extract_strided_slice %90 {offsets = [0, 0], sizes = [4, 4], strides = [1, 1]} : vector<4x8xf32> to vector<4x4xf32>
    %92 = tpu.concatenate %53, %91 in 1 : vector<4x4xf32>, vector<4x4xf32> -> vector<4x8xf32>
    %93 = arith.mulf %90, %92 : vector<4x8xf32>
    %94 = vector.extract_strided_slice %93 {offsets = [0, 7], sizes = [4, 1], strides = [1, 1]} : vector<4x8xf32> to vector<4x1xf32>
    %95 = vector.broadcast %94 : vector<4x1xf32> to vector<4x8xf32>
    %96 = arith.mulf %16, %95 : vector<4x8xf32>
    %97 = vector.extract_strided_slice %82 {offsets = [0, 0], sizes = [4, 1], strides = [1, 1]} : vector<4x8xf32> to vector<4x1xf32>
    %98 = vector.broadcast %97 : vector<4x1xf32> to vector<4x8xf32>
    %99 = arith.mulf %98, %93 : vector<4x8xf32>
    %100 = arith.mulf %18, %99 : vector<4x8xf32>
    %101 = arith.addf %96, %100 : vector<4x8xf32>
    %102 = arith.mulf %78, %26 : vector<4x8xf32>
    %103 = arith.mulf %79, %42 : vector<4x8xf32>
    %104 = arith.subf %102, %103 : vector<4x8xf32>
    %105 = arith.mulf %104, %18 : vector<4x8xf32>
    %106 = arith.addf %105, %16 : vector<4x8xf32>
    %107 = vector.extract_strided_slice %106 {offsets = [0, 0], sizes = [4, 7], strides = [1, 1]} : vector<4x8xf32> to vector<4x7xf32>
    %108 = tpu.concatenate %51, %107 in 1 : vector<4x1xf32>, vector<4x7xf32> -> vector<4x8xf32>
    %109 = arith.mulf %106, %108 : vector<4x8xf32>
    %110 = vector.extract_strided_slice %109 {offsets = [0, 0], sizes = [4, 6], strides = [1, 1]} : vector<4x8xf32> to vector<4x6xf32>
    %111 = tpu.concatenate %52, %110 in 1 : vector<4x2xf32>, vector<4x6xf32> -> vector<4x8xf32>
    %112 = arith.mulf %109, %111 : vector<4x8xf32>
    %113 = vector.extract_strided_slice %112 {offsets = [0, 0], sizes = [4, 4], strides = [1, 1]} : vector<4x8xf32> to vector<4x4xf32>
    %114 = tpu.concatenate %53, %113 in 1 : vector<4x4xf32>, vector<4x4xf32> -> vector<4x8xf32>
    %115 = arith.mulf %112, %114 : vector<4x8xf32>
    %116 = vector.extract_strided_slice %115 {offsets = [0, 7], sizes = [4, 1], strides = [1, 1]} : vector<4x8xf32> to vector<4x1xf32>
    %117 = vector.broadcast %116 : vector<4x1xf32> to vector<4x8xf32>
    %118 = arith.mulf %16, %117 : vector<4x8xf32>
    %119 = vector.extract_strided_slice %104 {offsets = [0, 0], sizes = [4, 1], strides = [1, 1]} : vector<4x8xf32> to vector<4x1xf32>
    %120 = vector.broadcast %119 : vector<4x1xf32> to vector<4x8xf32>
    %121 = arith.mulf %120, %115 : vector<4x8xf32>
    %122 = arith.mulf %18, %121 : vector<4x8xf32>
    %123 = arith.addf %118, %122 : vector<4x8xf32>
    %124 = arith.mulf %78, %30 : vector<4x8xf32>
    %125 = arith.mulf %79, %46 : vector<4x8xf32>
    %126 = arith.subf %124, %125 : vector<4x8xf32>
    %127 = arith.mulf %126, %18 : vector<4x8xf32>
    %128 = arith.addf %127, %16 : vector<4x8xf32>
    %129 = vector.extract_strided_slice %128 {offsets = [0, 0], sizes = [4, 7], strides = [1, 1]} : vector<4x8xf32> to vector<4x7xf32>
    %130 = tpu.concatenate %51, %129 in 1 : vector<4x1xf32>, vector<4x7xf32> -> vector<4x8xf32>
    %131 = arith.mulf %128, %130 : vector<4x8xf32>
    %132 = vector.extract_strided_slice %131 {offsets = [0, 0], sizes = [4, 6], strides = [1, 1]} : vector<4x8xf32> to vector<4x6xf32>
    %133 = tpu.concatenate %52, %132 in 1 : vector<4x2xf32>, vector<4x6xf32> -> vector<4x8xf32>
    %134 = arith.mulf %131, %133 : vector<4x8xf32>
    %135 = vector.extract_strided_slice %134 {offsets = [0, 0], sizes = [4, 4], strides = [1, 1]} : vector<4x8xf32> to vector<4x4xf32>
    %136 = tpu.concatenate %53, %135 in 1 : vector<4x4xf32>, vector<4x4xf32> -> vector<4x8xf32>
    %137 = arith.mulf %134, %136 : vector<4x8xf32>
    %138 = vector.extract_strided_slice %137 {offsets = [0, 7], sizes = [4, 1], strides = [1, 1]} : vector<4x8xf32> to vector<4x1xf32>
    %139 = vector.broadcast %138 : vector<4x1xf32> to vector<4x8xf32>
    %140 = arith.mulf %16, %139 : vector<4x8xf32>
    %141 = vector.extract_strided_slice %126 {offsets = [0, 0], sizes = [4, 1], strides = [1, 1]} : vector<4x8xf32> to vector<4x1xf32>
    %142 = vector.broadcast %141 : vector<4x1xf32> to vector<4x8xf32>
    %143 = arith.mulf %142, %137 : vector<4x8xf32>
    %144 = arith.mulf %18, %143 : vector<4x8xf32>
    %145 = arith.addf %140, %144 : vector<4x8xf32>
    %146 = arith.mulf %78, %34 : vector<4x8xf32>
    %147 = arith.mulf %79, %50 : vector<4x8xf32>
    %148 = arith.subf %146, %147 : vector<4x8xf32>
    %149 = arith.mulf %148, %18 : vector<4x8xf32>
    %150 = arith.addf %149, %16 : vector<4x8xf32>
    %151 = vector.extract_strided_slice %150 {offsets = [0, 0], sizes = [4, 7], strides = [1, 1]} : vector<4x8xf32> to vector<4x7xf32>
    %152 = tpu.concatenate %51, %151 in 1 : vector<4x1xf32>, vector<4x7xf32> -> vector<4x8xf32>
    %153 = arith.mulf %150, %152 : vector<4x8xf32>
    %154 = vector.extract_strided_slice %153 {offsets = [0, 0], sizes = [4, 6], strides = [1, 1]} : vector<4x8xf32> to vector<4x6xf32>
    %155 = tpu.concatenate %52, %154 in 1 : vector<4x2xf32>, vector<4x6xf32> -> vector<4x8xf32>
    %156 = arith.mulf %153, %155 : vector<4x8xf32>
    %157 = vector.extract_strided_slice %156 {offsets = [0, 0], sizes = [4, 4], strides = [1, 1]} : vector<4x8xf32> to vector<4x4xf32>
    %158 = tpu.concatenate %53, %157 in 1 : vector<4x4xf32>, vector<4x4xf32> -> vector<4x8xf32>
    %159 = arith.mulf %156, %158 : vector<4x8xf32>
    %160 = vector.extract_strided_slice %159 {offsets = [0, 7], sizes = [4, 1], strides = [1, 1]} : vector<4x8xf32> to vector<4x1xf32>
    %161 = vector.broadcast %160 : vector<4x1xf32> to vector<4x8xf32>
    %162 = arith.mulf %16, %161 : vector<4x8xf32>
    %163 = vector.extract_strided_slice %148 {offsets = [0, 0], sizes = [4, 1], strides = [1, 1]} : vector<4x8xf32> to vector<4x1xf32>
    %164 = vector.broadcast %163 : vector<4x1xf32> to vector<4x8xf32>
    %165 = arith.mulf %164, %159 : vector<4x8xf32>
    %166 = arith.mulf %18, %165 : vector<4x8xf32>
    %167 = arith.addf %162, %166 : vector<4x8xf32>
    %cst_62 = arith.constant dense<0.000000e+00> : vector<4x32xf32>
    %168 = tpu.matmul %101, %2, %cst_62 {dimension_numbers = #tpu.dot_dimension_numbers<[1], [0], [0], [1], [0, 0, 1, 1], [], []>} : vector<4x8xf32>, vector<8x32xf32>, vector<4x32xf32> -> vector<4x32xf32>
    %169 = arith.addf %168, %10 : vector<4x32xf32>
    %cst_63 = arith.constant dense<0.000000e+00> : vector<4x32xf32>
    %170 = tpu.matmul %123, %2, %cst_63 {dimension_numbers = #tpu.dot_dimension_numbers<[1], [0], [0], [1], [0, 0, 1, 1], [], []>} : vector<4x8xf32>, vector<8x32xf32>, vector<4x32xf32> -> vector<4x32xf32>
    %171 = arith.addf %170, %10 : vector<4x32xf32>
    %cst_64 = arith.constant dense<0.000000e+00> : vector<4x32xf32>
    %172 = tpu.matmul %145, %2, %cst_64 {dimension_numbers = #tpu.dot_dimension_numbers<[1], [0], [0], [1], [0, 0, 1, 1], [], []>} : vector<4x8xf32>, vector<8x32xf32>, vector<4x32xf32> -> vector<4x32xf32>
    %173 = arith.addf %172, %10 : vector<4x32xf32>
    %cst_65 = arith.constant dense<0.000000e+00> : vector<4x32xf32>
    %174 = tpu.matmul %167, %2, %cst_65 {dimension_numbers = #tpu.dot_dimension_numbers<[1], [0], [0], [1], [0, 0, 1, 1], [], []>} : vector<4x8xf32>, vector<8x32xf32>, vector<4x32xf32> -> vector<4x32xf32>
    %175 = arith.addf %174, %10 : vector<4x32xf32>
    %176 = arith.negf %169 : vector<4x32xf32>
    %177 = math.exp %176 : vector<4x32xf32>
    %cst_66 = arith.constant 1.000000e+00 : f32
    %178 = vector.broadcast %cst_66 : f32 to vector<4x32xf32>
    %179 = arith.addf %178, %177 : vector<4x32xf32>
    %180 = arith.divf %178, %179 : vector<4x32xf32>
    %181 = arith.negf %171 : vector<4x32xf32>
    %182 = math.exp %181 : vector<4x32xf32>
    %cst_67 = arith.constant 1.000000e+00 : f32
    %183 = vector.broadcast %cst_67 : f32 to vector<4x32xf32>
    %184 = arith.addf %183, %182 : vector<4x32xf32>
    %185 = arith.divf %183, %184 : vector<4x32xf32>
    %186 = math.tanh %173 : vector<4x32xf32>
    %187 = arith.negf %175 : vector<4x32xf32>
    %188 = math.exp %187 : vector<4x32xf32>
    %cst_68 = arith.constant 1.000000e+00 : f32
    %189 = vector.broadcast %cst_68 : f32 to vector<4x32xf32>
    %190 = arith.addf %189, %188 : vector<4x32xf32>
    %191 = arith.divf %189, %190 : vector<4x32xf32>
    %192 = arith.mulf %72, %185 : vector<4x32xf32>
    %193 = arith.mulf %180, %186 : vector<4x32xf32>
    %194 = arith.addf %192, %193 : vector<4x32xf32>
    %195 = math.tanh %194 : vector<4x32xf32>
    %196 = arith.mulf %191, %195 : vector<4x32xf32>
    %cst_69 = arith.constant dense<0.000000e+00> : vector<4x8xf32>
    %197 = tpu.matmul %196, %3, %cst_69 {dimension_numbers = #tpu.dot_dimension_numbers<[1], [0], [0], [1], [0, 0, 1, 1], [], []>} : vector<4x32xf32>, vector<32x8xf32>, vector<4x8xf32> -> vector<4x8xf32>
    %198 = arith.addf %197, %13 : vector<4x8xf32>
    %c0_70 = arith.constant 0 : index
    %c0_71 = arith.constant 0 : index
    %c0_72 = arith.constant 0 : index
    %199 = vector.load %arg3[%c0_70, %c0_71, %c0_72] : memref<3x4x8xf32, #tpu.memory_space<vmem>>, vector<1x4x8xf32>
    %200 = vector.shape_cast %199 : vector<1x4x8xf32> to vector<4x8xf32>
    %201 = arith.addf %198, %200 : vector<4x8xf32>
    %cst_73 = arith.constant dense<0xFF800000> : vector<4xf32>
    %202 = vector.multi_reduction <maximumf>, %201, %cst_73 [1] : vector<4x8xf32> to vector<4xf32>
    %203 = vector.shape_cast %202 : vector<4xf32> to vector<4x1xf32>
    %204 = vector.broadcast %203 : vector<4x1xf32> to vector<4x8xf32>
    %205 = arith.subf %201, %204 : vector<4x8xf32>
    %206 = math.exp %205 : vector<4x8xf32>
    %cst_74 = arith.constant dense<0.000000e+00> : vector<4xf32>
    %207 = vector.multi_reduction <add>, %206, %cst_74 [1] : vector<4x8xf32> to vector<4xf32>
    %208 = vector.shape_cast %207 : vector<4xf32> to vector<4x1xf32>
    %209 = tpu.reciprocal %208 {approx = true} : vector<4x1xf32> -> vector<4x1xf32>
    %210 = vector.broadcast %209 : vector<4x1xf32> to vector<4x8xf32>
    %211 = arith.mulf %206, %210 : vector<4x8xf32>
    %cst_75 = arith.constant 0.000000e+00 : f32
    %212 = vector.broadcast %cst_75 : f32 to vector<4x8xf32>
    %213 = arith.cmpf oeq, %205, %212 : vector<4x8xf32>
    %214 = arith.extui %213 : vector<4x8xi1> to vector<4x8xi32>
    %215 = arith.sitofp %214 : vector<4x8xi32> to vector<4x8xf32>
    %216 = arith.subf %215, %211 : vector<4x8xf32>
    %217 = arith.addf %216, %211 : vector<4x8xf32>
    %cst_76 = arith.constant dense<0.000000e+00> : vector<4x16xf32>
    %218 = tpu.matmul %217, %4, %cst_76 {dimension_numbers = #tpu.dot_dimension_numbers<[1], [0], [0], [1], [0, 0, 1, 1], [], []>} : vector<4x8xf32>, vector<8x16xf32>, vector<4x16xf32> -> vector<4x16xf32>
    %cst_77 = arith.constant dense<0.000000e+00> : vector<4x8xf32>
    %219 = tpu.matmul %218, %0, %cst_77 {dimension_numbers = #tpu.dot_dimension_numbers<[1], [0], [0], [1], [0, 0, 1, 1], [], []>} : vector<4x16xf32>, vector<16x8xf32>, vector<4x8xf32> -> vector<4x8xf32>
    %cst_78 = arith.constant dense<0.000000e+00> : vector<4x8xf32>
    %220 = tpu.matmul %196, %1, %cst_78 {dimension_numbers = #tpu.dot_dimension_numbers<[1], [0], [0], [1], [0, 0, 1, 1], [], []>} : vector<4x32xf32>, vector<32x8xf32>, vector<4x8xf32> -> vector<4x8xf32>
    %221 = arith.addf %219, %220 : vector<4x8xf32>
    %222 = arith.addf %221, %7 : vector<4x8xf32>
    %223 = math.cos %222 : vector<4x8xf32>
    %224 = math.sin %222 : vector<4x8xf32>
    %225 = arith.mulf %223, %22 : vector<4x8xf32>
    %226 = arith.mulf %224, %38 : vector<4x8xf32>
    %227 = arith.subf %225, %226 : vector<4x8xf32>
    %228 = arith.mulf %227, %18 : vector<4x8xf32>
    %229 = arith.addf %228, %16 : vector<4x8xf32>
    %230 = vector.extract_strided_slice %229 {offsets = [0, 0], sizes = [4, 7], strides = [1, 1]} : vector<4x8xf32> to vector<4x7xf32>
    %231 = tpu.concatenate %51, %230 in 1 : vector<4x1xf32>, vector<4x7xf32> -> vector<4x8xf32>
    %232 = arith.mulf %229, %231 : vector<4x8xf32>
    %233 = vector.extract_strided_slice %232 {offsets = [0, 0], sizes = [4, 6], strides = [1, 1]} : vector<4x8xf32> to vector<4x6xf32>
    %234 = tpu.concatenate %52, %233 in 1 : vector<4x2xf32>, vector<4x6xf32> -> vector<4x8xf32>
    %235 = arith.mulf %232, %234 : vector<4x8xf32>
    %236 = vector.extract_strided_slice %235 {offsets = [0, 0], sizes = [4, 4], strides = [1, 1]} : vector<4x8xf32> to vector<4x4xf32>
    %237 = tpu.concatenate %53, %236 in 1 : vector<4x4xf32>, vector<4x4xf32> -> vector<4x8xf32>
    %238 = arith.mulf %235, %237 : vector<4x8xf32>
    %239 = vector.extract_strided_slice %238 {offsets = [0, 7], sizes = [4, 1], strides = [1, 1]} : vector<4x8xf32> to vector<4x1xf32>
    %240 = vector.broadcast %239 : vector<4x1xf32> to vector<4x8xf32>
    %241 = arith.mulf %16, %240 : vector<4x8xf32>
    %242 = vector.extract_strided_slice %227 {offsets = [0, 0], sizes = [4, 1], strides = [1, 1]} : vector<4x8xf32> to vector<4x1xf32>
    %243 = vector.broadcast %242 : vector<4x1xf32> to vector<4x8xf32>
    %244 = arith.mulf %243, %238 : vector<4x8xf32>
    %245 = arith.mulf %18, %244 : vector<4x8xf32>
    %246 = arith.addf %241, %245 : vector<4x8xf32>
    %247 = arith.mulf %223, %26 : vector<4x8xf32>
    %248 = arith.mulf %224, %42 : vector<4x8xf32>
    %249 = arith.subf %247, %248 : vector<4x8xf32>
    %250 = arith.mulf %249, %18 : vector<4x8xf32>
    %251 = arith.addf %250, %16 : vector<4x8xf32>
    %252 = vector.extract_strided_slice %251 {offsets = [0, 0], sizes = [4, 7], strides = [1, 1]} : vector<4x8xf32> to vector<4x7xf32>
    %253 = tpu.concatenate %51, %252 in 1 : vector<4x1xf32>, vector<4x7xf32> -> vector<4x8xf32>
    %254 = arith.mulf %251, %253 : vector<4x8xf32>
    %255 = vector.extract_strided_slice %254 {offsets = [0, 0], sizes = [4, 6], strides = [1, 1]} : vector<4x8xf32> to vector<4x6xf32>
    %256 = tpu.concatenate %52, %255 in 1 : vector<4x2xf32>, vector<4x6xf32> -> vector<4x8xf32>
    %257 = arith.mulf %254, %256 : vector<4x8xf32>
    %258 = vector.extract_strided_slice %257 {offsets = [0, 0], sizes = [4, 4], strides = [1, 1]} : vector<4x8xf32> to vector<4x4xf32>
    %259 = tpu.concatenate %53, %258 in 1 : vector<4x4xf32>, vector<4x4xf32> -> vector<4x8xf32>
    %260 = arith.mulf %257, %259 : vector<4x8xf32>
    %261 = vector.extract_strided_slice %260 {offsets = [0, 7], sizes = [4, 1], strides = [1, 1]} : vector<4x8xf32> to vector<4x1xf32>
    %262 = vector.broadcast %261 : vector<4x1xf32> to vector<4x8xf32>
    %263 = arith.mulf %16, %262 : vector<4x8xf32>
    %264 = vector.extract_strided_slice %249 {offsets = [0, 0], sizes = [4, 1], strides = [1, 1]} : vector<4x8xf32> to vector<4x1xf32>
    %265 = vector.broadcast %264 : vector<4x1xf32> to vector<4x8xf32>
    %266 = arith.mulf %265, %260 : vector<4x8xf32>
    %267 = arith.mulf %18, %266 : vector<4x8xf32>
    %268 = arith.addf %263, %267 : vector<4x8xf32>
    %269 = arith.mulf %223, %30 : vector<4x8xf32>
    %270 = arith.mulf %224, %46 : vector<4x8xf32>
    %271 = arith.subf %269, %270 : vector<4x8xf32>
    %272 = arith.mulf %271, %18 : vector<4x8xf32>
    %273 = arith.addf %272, %16 : vector<4x8xf32>
    %274 = vector.extract_strided_slice %273 {offsets = [0, 0], sizes = [4, 7], strides = [1, 1]} : vector<4x8xf32> to vector<4x7xf32>
    %275 = tpu.concatenate %51, %274 in 1 : vector<4x1xf32>, vector<4x7xf32> -> vector<4x8xf32>
    %276 = arith.mulf %273, %275 : vector<4x8xf32>
    %277 = vector.extract_strided_slice %276 {offsets = [0, 0], sizes = [4, 6], strides = [1, 1]} : vector<4x8xf32> to vector<4x6xf32>
    %278 = tpu.concatenate %52, %277 in 1 : vector<4x2xf32>, vector<4x6xf32> -> vector<4x8xf32>
    %279 = arith.mulf %276, %278 : vector<4x8xf32>
    %280 = vector.extract_strided_slice %279 {offsets = [0, 0], sizes = [4, 4], strides = [1, 1]} : vector<4x8xf32> to vector<4x4xf32>
    %281 = tpu.concatenate %53, %280 in 1 : vector<4x4xf32>, vector<4x4xf32> -> vector<4x8xf32>
    %282 = arith.mulf %279, %281 : vector<4x8xf32>
    %283 = vector.extract_strided_slice %282 {offsets = [0, 7], sizes = [4, 1], strides = [1, 1]} : vector<4x8xf32> to vector<4x1xf32>
    %284 = vector.broadcast %283 : vector<4x1xf32> to vector<4x8xf32>
    %285 = arith.mulf %16, %284 : vector<4x8xf32>
    %286 = vector.extract_strided_slice %271 {offsets = [0, 0], sizes = [4, 1], strides = [1, 1]} : vector<4x8xf32> to vector<4x1xf32>
    %287 = vector.broadcast %286 : vector<4x1xf32> to vector<4x8xf32>
    %288 = arith.mulf %287, %282 : vector<4x8xf32>
    %289 = arith.mulf %18, %288 : vector<4x8xf32>
    %290 = arith.addf %285, %289 : vector<4x8xf32>
    %291 = arith.mulf %223, %34 : vector<4x8xf32>
    %292 = arith.mulf %224, %50 : vector<4x8xf32>
    %293 = arith.subf %291, %292 : vector<4x8xf32>
    %294 = arith.mulf %293, %18 : vector<4x8xf32>
    %295 = arith.addf %294, %16 : vector<4x8xf32>
    %296 = vector.extract_strided_slice %295 {offsets = [0, 0], sizes = [4, 7], strides = [1, 1]} : vector<4x8xf32> to vector<4x7xf32>
    %297 = tpu.concatenate %51, %296 in 1 : vector<4x1xf32>, vector<4x7xf32> -> vector<4x8xf32>
    %298 = arith.mulf %295, %297 : vector<4x8xf32>
    %299 = vector.extract_strided_slice %298 {offsets = [0, 0], sizes = [4, 6], strides = [1, 1]} : vector<4x8xf32> to vector<4x6xf32>
    %300 = tpu.concatenate %52, %299 in 1 : vector<4x2xf32>, vector<4x6xf32> -> vector<4x8xf32>
    %301 = arith.mulf %298, %300 : vector<4x8xf32>
    %302 = vector.extract_strided_slice %301 {offsets = [0, 0], sizes = [4, 4], strides = [1, 1]} : vector<4x8xf32> to vector<4x4xf32>
    %303 = tpu.concatenate %53, %302 in 1 : vector<4x4xf32>, vector<4x4xf32> -> vector<4x8xf32>
    %304 = arith.mulf %301, %303 : vector<4x8xf32>
    %305 = vector.extract_strided_slice %304 {offsets = [0, 7], sizes = [4, 1], strides = [1, 1]} : vector<4x8xf32> to vector<4x1xf32>
    %306 = vector.broadcast %305 : vector<4x1xf32> to vector<4x8xf32>
    %307 = arith.mulf %16, %306 : vector<4x8xf32>
    %308 = vector.extract_strided_slice %293 {offsets = [0, 0], sizes = [4, 1], strides = [1, 1]} : vector<4x8xf32> to vector<4x1xf32>
    %309 = vector.broadcast %308 : vector<4x1xf32> to vector<4x8xf32>
    %310 = arith.mulf %309, %304 : vector<4x8xf32>
    %311 = arith.mulf %18, %310 : vector<4x8xf32>
    %312 = arith.addf %307, %311 : vector<4x8xf32>
    %cst_79 = arith.constant dense<0.000000e+00> : vector<4x32xf32>
    %313 = tpu.matmul %246, %2, %cst_79 {dimension_numbers = #tpu.dot_dimension_numbers<[1], [0], [0], [1], [0, 0, 1, 1], [], []>} : vector<4x8xf32>, vector<8x32xf32>, vector<4x32xf32> -> vector<4x32xf32>
    %314 = arith.addf %313, %10 : vector<4x32xf32>
    %cst_80 = arith.constant dense<0.000000e+00> : vector<4x32xf32>
    %315 = tpu.matmul %268, %2, %cst_80 {dimension_numbers = #tpu.dot_dimension_numbers<[1], [0], [0], [1], [0, 0, 1, 1], [], []>} : vector<4x8xf32>, vector<8x32xf32>, vector<4x32xf32> -> vector<4x32xf32>
    %316 = arith.addf %315, %10 : vector<4x32xf32>
    %cst_81 = arith.constant dense<0.000000e+00> : vector<4x32xf32>
    %317 = tpu.matmul %290, %2, %cst_81 {dimension_numbers = #tpu.dot_dimension_numbers<[1], [0], [0], [1], [0, 0, 1, 1], [], []>} : vector<4x8xf32>, vector<8x32xf32>, vector<4x32xf32> -> vector<4x32xf32>
    %318 = arith.addf %317, %10 : vector<4x32xf32>
    %cst_82 = arith.constant dense<0.000000e+00> : vector<4x32xf32>
    %319 = tpu.matmul %312, %2, %cst_82 {dimension_numbers = #tpu.dot_dimension_numbers<[1], [0], [0], [1], [0, 0, 1, 1], [], []>} : vector<4x8xf32>, vector<8x32xf32>, vector<4x32xf32> -> vector<4x32xf32>
    %320 = arith.addf %319, %10 : vector<4x32xf32>
    %321 = arith.negf %314 : vector<4x32xf32>
    %322 = math.exp %321 : vector<4x32xf32>
    %cst_83 = arith.constant 1.000000e+00 : f32
    %323 = vector.broadcast %cst_83 : f32 to vector<4x32xf32>
    %324 = arith.addf %323, %322 : vector<4x32xf32>
    %325 = arith.divf %323, %324 : vector<4x32xf32>
    %326 = arith.negf %316 : vector<4x32xf32>
    %327 = math.exp %326 : vector<4x32xf32>
    %cst_84 = arith.constant 1.000000e+00 : f32
    %328 = vector.broadcast %cst_84 : f32 to vector<4x32xf32>
    %329 = arith.addf %328, %327 : vector<4x32xf32>
    %330 = arith.divf %328, %329 : vector<4x32xf32>
    %331 = math.tanh %318 : vector<4x32xf32>
    %332 = arith.negf %320 : vector<4x32xf32>
    %333 = math.exp %332 : vector<4x32xf32>
    %cst_85 = arith.constant 1.000000e+00 : f32
    %334 = vector.broadcast %cst_85 : f32 to vector<4x32xf32>
    %335 = arith.addf %334, %333 : vector<4x32xf32>
    %336 = arith.divf %334, %335 : vector<4x32xf32>
    %337 = arith.mulf %194, %330 : vector<4x32xf32>
    %338 = arith.mulf %325, %331 : vector<4x32xf32>
    %339 = arith.addf %337, %338 : vector<4x32xf32>
    %340 = math.tanh %339 : vector<4x32xf32>
    %341 = arith.mulf %336, %340 : vector<4x32xf32>
    %cst_86 = arith.constant dense<0.000000e+00> : vector<4x8xf32>
    %342 = tpu.matmul %341, %3, %cst_86 {dimension_numbers = #tpu.dot_dimension_numbers<[1], [0], [0], [1], [0, 0, 1, 1], [], []>} : vector<4x32xf32>, vector<32x8xf32>, vector<4x8xf32> -> vector<4x8xf32>
    %343 = arith.addf %342, %13 : vector<4x8xf32>
    %c1_87 = arith.constant 1 : index
    %c0_88 = arith.constant 0 : index
    %c0_89 = arith.constant 0 : index
    %344 = vector.load %arg3[%c1_87, %c0_88, %c0_89] : memref<3x4x8xf32, #tpu.memory_space<vmem>>, vector<1x4x8xf32>
    %345 = vector.shape_cast %344 : vector<1x4x8xf32> to vector<4x8xf32>
    %346 = arith.addf %343, %345 : vector<4x8xf32>
    %cst_90 = arith.constant dense<0xFF800000> : vector<4xf32>
    %347 = vector.multi_reduction <maximumf>, %346, %cst_90 [1] : vector<4x8xf32> to vector<4xf32>
    %348 = vector.shape_cast %347 : vector<4xf32> to vector<4x1xf32>
    %349 = vector.broadcast %348 : vector<4x1xf32> to vector<4x8xf32>
    %350 = arith.subf %346, %349 : vector<4x8xf32>
    %351 = math.exp %350 : vector<4x8xf32>
    %cst_91 = arith.constant dense<0.000000e+00> : vector<4xf32>
    %352 = vector.multi_reduction <add>, %351, %cst_91 [1] : vector<4x8xf32> to vector<4xf32>
    %353 = vector.shape_cast %352 : vector<4xf32> to vector<4x1xf32>
    %354 = tpu.reciprocal %353 {approx = true} : vector<4x1xf32> -> vector<4x1xf32>
    %355 = vector.broadcast %354 : vector<4x1xf32> to vector<4x8xf32>
    %356 = arith.mulf %351, %355 : vector<4x8xf32>
    %cst_92 = arith.constant 0.000000e+00 : f32
    %357 = vector.broadcast %cst_92 : f32 to vector<4x8xf32>
    %358 = arith.cmpf oeq, %350, %357 : vector<4x8xf32>
    %359 = arith.extui %358 : vector<4x8xi1> to vector<4x8xi32>
    %360 = arith.sitofp %359 : vector<4x8xi32> to vector<4x8xf32>
    %361 = arith.subf %360, %356 : vector<4x8xf32>
    %362 = arith.addf %361, %356 : vector<4x8xf32>
    %cst_93 = arith.constant dense<0.000000e+00> : vector<4x16xf32>
    %363 = tpu.matmul %362, %4, %cst_93 {dimension_numbers = #tpu.dot_dimension_numbers<[1], [0], [0], [1], [0, 0, 1, 1], [], []>} : vector<4x8xf32>, vector<8x16xf32>, vector<4x16xf32> -> vector<4x16xf32>
    %cst_94 = arith.constant dense<0.000000e+00> : vector<4x8xf32>
    %364 = tpu.matmul %363, %0, %cst_94 {dimension_numbers = #tpu.dot_dimension_numbers<[1], [0], [0], [1], [0, 0, 1, 1], [], []>} : vector<4x16xf32>, vector<16x8xf32>, vector<4x8xf32> -> vector<4x8xf32>
    %cst_95 = arith.constant dense<0.000000e+00> : vector<4x8xf32>
    %365 = tpu.matmul %341, %1, %cst_95 {dimension_numbers = #tpu.dot_dimension_numbers<[1], [0], [0], [1], [0, 0, 1, 1], [], []>} : vector<4x32xf32>, vector<32x8xf32>, vector<4x8xf32> -> vector<4x8xf32>
    %366 = arith.addf %364, %365 : vector<4x8xf32>
    %367 = arith.addf %366, %7 : vector<4x8xf32>
    %368 = math.cos %367 : vector<4x8xf32>
    %369 = math.sin %367 : vector<4x8xf32>
    %370 = arith.mulf %368, %22 : vector<4x8xf32>
    %371 = arith.mulf %369, %38 : vector<4x8xf32>
    %372 = arith.subf %370, %371 : vector<4x8xf32>
    %373 = arith.mulf %372, %18 : vector<4x8xf32>
    %374 = arith.addf %373, %16 : vector<4x8xf32>
    %375 = vector.extract_strided_slice %374 {offsets = [0, 0], sizes = [4, 7], strides = [1, 1]} : vector<4x8xf32> to vector<4x7xf32>
    %376 = tpu.concatenate %51, %375 in 1 : vector<4x1xf32>, vector<4x7xf32> -> vector<4x8xf32>
    %377 = arith.mulf %374, %376 : vector<4x8xf32>
    %378 = vector.extract_strided_slice %377 {offsets = [0, 0], sizes = [4, 6], strides = [1, 1]} : vector<4x8xf32> to vector<4x6xf32>
    %379 = tpu.concatenate %52, %378 in 1 : vector<4x2xf32>, vector<4x6xf32> -> vector<4x8xf32>
    %380 = arith.mulf %377, %379 : vector<4x8xf32>
    %381 = vector.extract_strided_slice %380 {offsets = [0, 0], sizes = [4, 4], strides = [1, 1]} : vector<4x8xf32> to vector<4x4xf32>
    %382 = tpu.concatenate %53, %381 in 1 : vector<4x4xf32>, vector<4x4xf32> -> vector<4x8xf32>
    %383 = arith.mulf %380, %382 : vector<4x8xf32>
    %384 = vector.extract_strided_slice %383 {offsets = [0, 7], sizes = [4, 1], strides = [1, 1]} : vector<4x8xf32> to vector<4x1xf32>
    %385 = vector.broadcast %384 : vector<4x1xf32> to vector<4x8xf32>
    %386 = arith.mulf %16, %385 : vector<4x8xf32>
    %387 = vector.extract_strided_slice %372 {offsets = [0, 0], sizes = [4, 1], strides = [1, 1]} : vector<4x8xf32> to vector<4x1xf32>
    %388 = vector.broadcast %387 : vector<4x1xf32> to vector<4x8xf32>
    %389 = arith.mulf %388, %383 : vector<4x8xf32>
    %390 = arith.mulf %18, %389 : vector<4x8xf32>
    %391 = arith.addf %386, %390 : vector<4x8xf32>
    %392 = arith.mulf %368, %26 : vector<4x8xf32>
    %393 = arith.mulf %369, %42 : vector<4x8xf32>
    %394 = arith.subf %392, %393 : vector<4x8xf32>
    %395 = arith.mulf %394, %18 : vector<4x8xf32>
    %396 = arith.addf %395, %16 : vector<4x8xf32>
    %397 = vector.extract_strided_slice %396 {offsets = [0, 0], sizes = [4, 7], strides = [1, 1]} : vector<4x8xf32> to vector<4x7xf32>
    %398 = tpu.concatenate %51, %397 in 1 : vector<4x1xf32>, vector<4x7xf32> -> vector<4x8xf32>
    %399 = arith.mulf %396, %398 : vector<4x8xf32>
    %400 = vector.extract_strided_slice %399 {offsets = [0, 0], sizes = [4, 6], strides = [1, 1]} : vector<4x8xf32> to vector<4x6xf32>
    %401 = tpu.concatenate %52, %400 in 1 : vector<4x2xf32>, vector<4x6xf32> -> vector<4x8xf32>
    %402 = arith.mulf %399, %401 : vector<4x8xf32>
    %403 = vector.extract_strided_slice %402 {offsets = [0, 0], sizes = [4, 4], strides = [1, 1]} : vector<4x8xf32> to vector<4x4xf32>
    %404 = tpu.concatenate %53, %403 in 1 : vector<4x4xf32>, vector<4x4xf32> -> vector<4x8xf32>
    %405 = arith.mulf %402, %404 : vector<4x8xf32>
    %406 = vector.extract_strided_slice %405 {offsets = [0, 7], sizes = [4, 1], strides = [1, 1]} : vector<4x8xf32> to vector<4x1xf32>
    %407 = vector.broadcast %406 : vector<4x1xf32> to vector<4x8xf32>
    %408 = arith.mulf %16, %407 : vector<4x8xf32>
    %409 = vector.extract_strided_slice %394 {offsets = [0, 0], sizes = [4, 1], strides = [1, 1]} : vector<4x8xf32> to vector<4x1xf32>
    %410 = vector.broadcast %409 : vector<4x1xf32> to vector<4x8xf32>
    %411 = arith.mulf %410, %405 : vector<4x8xf32>
    %412 = arith.mulf %18, %411 : vector<4x8xf32>
    %413 = arith.addf %408, %412 : vector<4x8xf32>
    %414 = arith.mulf %368, %30 : vector<4x8xf32>
    %415 = arith.mulf %369, %46 : vector<4x8xf32>
    %416 = arith.subf %414, %415 : vector<4x8xf32>
    %417 = arith.mulf %416, %18 : vector<4x8xf32>
    %418 = arith.addf %417, %16 : vector<4x8xf32>
    %419 = vector.extract_strided_slice %418 {offsets = [0, 0], sizes = [4, 7], strides = [1, 1]} : vector<4x8xf32> to vector<4x7xf32>
    %420 = tpu.concatenate %51, %419 in 1 : vector<4x1xf32>, vector<4x7xf32> -> vector<4x8xf32>
    %421 = arith.mulf %418, %420 : vector<4x8xf32>
    %422 = vector.extract_strided_slice %421 {offsets = [0, 0], sizes = [4, 6], strides = [1, 1]} : vector<4x8xf32> to vector<4x6xf32>
    %423 = tpu.concatenate %52, %422 in 1 : vector<4x2xf32>, vector<4x6xf32> -> vector<4x8xf32>
    %424 = arith.mulf %421, %423 : vector<4x8xf32>
    %425 = vector.extract_strided_slice %424 {offsets = [0, 0], sizes = [4, 4], strides = [1, 1]} : vector<4x8xf32> to vector<4x4xf32>
    %426 = tpu.concatenate %53, %425 in 1 : vector<4x4xf32>, vector<4x4xf32> -> vector<4x8xf32>
    %427 = arith.mulf %424, %426 : vector<4x8xf32>
    %428 = vector.extract_strided_slice %427 {offsets = [0, 7], sizes = [4, 1], strides = [1, 1]} : vector<4x8xf32> to vector<4x1xf32>
    %429 = vector.broadcast %428 : vector<4x1xf32> to vector<4x8xf32>
    %430 = arith.mulf %16, %429 : vector<4x8xf32>
    %431 = vector.extract_strided_slice %416 {offsets = [0, 0], sizes = [4, 1], strides = [1, 1]} : vector<4x8xf32> to vector<4x1xf32>
    %432 = vector.broadcast %431 : vector<4x1xf32> to vector<4x8xf32>
    %433 = arith.mulf %432, %427 : vector<4x8xf32>
    %434 = arith.mulf %18, %433 : vector<4x8xf32>
    %435 = arith.addf %430, %434 : vector<4x8xf32>
    %436 = arith.mulf %368, %34 : vector<4x8xf32>
    %437 = arith.mulf %369, %50 : vector<4x8xf32>
    %438 = arith.subf %436, %437 : vector<4x8xf32>
    %439 = arith.mulf %438, %18 : vector<4x8xf32>
    %440 = arith.addf %439, %16 : vector<4x8xf32>
    %441 = vector.extract_strided_slice %440 {offsets = [0, 0], sizes = [4, 7], strides = [1, 1]} : vector<4x8xf32> to vector<4x7xf32>
    %442 = tpu.concatenate %51, %441 in 1 : vector<4x1xf32>, vector<4x7xf32> -> vector<4x8xf32>
    %443 = arith.mulf %440, %442 : vector<4x8xf32>
    %444 = vector.extract_strided_slice %443 {offsets = [0, 0], sizes = [4, 6], strides = [1, 1]} : vector<4x8xf32> to vector<4x6xf32>
    %445 = tpu.concatenate %52, %444 in 1 : vector<4x2xf32>, vector<4x6xf32> -> vector<4x8xf32>
    %446 = arith.mulf %443, %445 : vector<4x8xf32>
    %447 = vector.extract_strided_slice %446 {offsets = [0, 0], sizes = [4, 4], strides = [1, 1]} : vector<4x8xf32> to vector<4x4xf32>
    %448 = tpu.concatenate %53, %447 in 1 : vector<4x4xf32>, vector<4x4xf32> -> vector<4x8xf32>
    %449 = arith.mulf %446, %448 : vector<4x8xf32>
    %450 = vector.extract_strided_slice %449 {offsets = [0, 7], sizes = [4, 1], strides = [1, 1]} : vector<4x8xf32> to vector<4x1xf32>
    %451 = vector.broadcast %450 : vector<4x1xf32> to vector<4x8xf32>
    %452 = arith.mulf %16, %451 : vector<4x8xf32>
    %453 = vector.extract_strided_slice %438 {offsets = [0, 0], sizes = [4, 1], strides = [1, 1]} : vector<4x8xf32> to vector<4x1xf32>
    %454 = vector.broadcast %453 : vector<4x1xf32> to vector<4x8xf32>
    %455 = arith.mulf %454, %449 : vector<4x8xf32>
    %456 = arith.mulf %18, %455 : vector<4x8xf32>
    %457 = arith.addf %452, %456 : vector<4x8xf32>
    %cst_96 = arith.constant dense<0.000000e+00> : vector<4x32xf32>
    %458 = tpu.matmul %391, %2, %cst_96 {dimension_numbers = #tpu.dot_dimension_numbers<[1], [0], [0], [1], [0, 0, 1, 1], [], []>} : vector<4x8xf32>, vector<8x32xf32>, vector<4x32xf32> -> vector<4x32xf32>
    %459 = arith.addf %458, %10 : vector<4x32xf32>
    %cst_97 = arith.constant dense<0.000000e+00> : vector<4x32xf32>
    %460 = tpu.matmul %413, %2, %cst_97 {dimension_numbers = #tpu.dot_dimension_numbers<[1], [0], [0], [1], [0, 0, 1, 1], [], []>} : vector<4x8xf32>, vector<8x32xf32>, vector<4x32xf32> -> vector<4x32xf32>
    %461 = arith.addf %460, %10 : vector<4x32xf32>
    %cst_98 = arith.constant dense<0.000000e+00> : vector<4x32xf32>
    %462 = tpu.matmul %435, %2, %cst_98 {dimension_numbers = #tpu.dot_dimension_numbers<[1], [0], [0], [1], [0, 0, 1, 1], [], []>} : vector<4x8xf32>, vector<8x32xf32>, vector<4x32xf32> -> vector<4x32xf32>
    %463 = arith.addf %462, %10 : vector<4x32xf32>
    %cst_99 = arith.constant dense<0.000000e+00> : vector<4x32xf32>
    %464 = tpu.matmul %457, %2, %cst_99 {dimension_numbers = #tpu.dot_dimension_numbers<[1], [0], [0], [1], [0, 0, 1, 1], [], []>} : vector<4x8xf32>, vector<8x32xf32>, vector<4x32xf32> -> vector<4x32xf32>
    %465 = arith.addf %464, %10 : vector<4x32xf32>
    %466 = arith.negf %459 : vector<4x32xf32>
    %467 = math.exp %466 : vector<4x32xf32>
    %cst_100 = arith.constant 1.000000e+00 : f32
    %468 = vector.broadcast %cst_100 : f32 to vector<4x32xf32>
    %469 = arith.addf %468, %467 : vector<4x32xf32>
    %470 = arith.divf %468, %469 : vector<4x32xf32>
    %471 = arith.negf %461 : vector<4x32xf32>
    %472 = math.exp %471 : vector<4x32xf32>
    %cst_101 = arith.constant 1.000000e+00 : f32
    %473 = vector.broadcast %cst_101 : f32 to vector<4x32xf32>
    %474 = arith.addf %473, %472 : vector<4x32xf32>
    %475 = arith.divf %473, %474 : vector<4x32xf32>
    %476 = math.tanh %463 : vector<4x32xf32>
    %477 = arith.negf %465 : vector<4x32xf32>
    %478 = math.exp %477 : vector<4x32xf32>
    %cst_102 = arith.constant 1.000000e+00 : f32
    %479 = vector.broadcast %cst_102 : f32 to vector<4x32xf32>
    %480 = arith.addf %479, %478 : vector<4x32xf32>
    %481 = arith.divf %479, %480 : vector<4x32xf32>
    %482 = arith.mulf %339, %475 : vector<4x32xf32>
    %483 = arith.mulf %470, %476 : vector<4x32xf32>
    %484 = arith.addf %482, %483 : vector<4x32xf32>
    %485 = math.tanh %484 : vector<4x32xf32>
    %486 = arith.mulf %481, %485 : vector<4x32xf32>
    %cst_103 = arith.constant dense<0.000000e+00> : vector<4x8xf32>
    %487 = tpu.matmul %486, %3, %cst_103 {dimension_numbers = #tpu.dot_dimension_numbers<[1], [0], [0], [1], [0, 0, 1, 1], [], []>} : vector<4x32xf32>, vector<32x8xf32>, vector<4x8xf32> -> vector<4x8xf32>
    %488 = arith.addf %487, %13 : vector<4x8xf32>
    %c2_104 = arith.constant 2 : index
    %c0_105 = arith.constant 0 : index
    %c0_106 = arith.constant 0 : index
    %489 = vector.load %arg3[%c2_104, %c0_105, %c0_106] : memref<3x4x8xf32, #tpu.memory_space<vmem>>, vector<1x4x8xf32>
    %490 = vector.shape_cast %489 : vector<1x4x8xf32> to vector<4x8xf32>
    %491 = arith.addf %488, %490 : vector<4x8xf32>
    %cst_107 = arith.constant dense<0xFF800000> : vector<4xf32>
    %492 = vector.multi_reduction <maximumf>, %491, %cst_107 [1] : vector<4x8xf32> to vector<4xf32>
    %493 = vector.shape_cast %492 : vector<4xf32> to vector<4x1xf32>
    %494 = vector.broadcast %493 : vector<4x1xf32> to vector<4x8xf32>
    %495 = arith.subf %491, %494 : vector<4x8xf32>
    %496 = math.exp %495 : vector<4x8xf32>
    %cst_108 = arith.constant dense<0.000000e+00> : vector<4xf32>
    %497 = vector.multi_reduction <add>, %496, %cst_108 [1] : vector<4x8xf32> to vector<4xf32>
    %498 = vector.shape_cast %497 : vector<4xf32> to vector<4x1xf32>
    %499 = tpu.reciprocal %498 {approx = true} : vector<4x1xf32> -> vector<4x1xf32>
    %500 = vector.broadcast %499 : vector<4x1xf32> to vector<4x8xf32>
    %501 = arith.mulf %496, %500 : vector<4x8xf32>
    %cst_109 = arith.constant 0.000000e+00 : f32
    %502 = vector.broadcast %cst_109 : f32 to vector<4x8xf32>
    %503 = arith.cmpf oeq, %495, %502 : vector<4x8xf32>
    %504 = arith.extui %503 : vector<4x8xi1> to vector<4x8xi32>
    %505 = arith.sitofp %504 : vector<4x8xi32> to vector<4x8xf32>
    %506 = arith.subf %505, %501 : vector<4x8xf32>
    %507 = arith.addf %506, %501 : vector<4x8xf32>
    %508 = vector.shape_cast %217 : vector<4x8xf32> to vector<1x4x8xf32>
    %509 = vector.shape_cast %362 : vector<4x8xf32> to vector<1x4x8xf32>
    %510 = vector.shape_cast %507 : vector<4x8xf32> to vector<1x4x8xf32>
    %511 = tpu.concatenate %508, %509, %510 in 0 : vector<1x4x8xf32>, vector<1x4x8xf32>, vector<1x4x8xf32> -> vector<3x4x8xf32>
    %c0_110 = arith.constant 0 : index
    %c0_111 = arith.constant 0 : index
    %c0_112 = arith.constant 0 : index
    %512 = vector.load %arg21[%c0_110, %c0_111, %c0_112] : memref<3x4x8xf32, #tpu.memory_space<vmem>>, vector<3x4x8xf32>
    tpu.vector_store %arg21[%c0_110, %c0_111, %c0_112], %511 {strides = array<i32>} : memref<3x4x8xf32, #tpu.memory_space<vmem>>, vector<3x4x8xf32>,
    return
  }
  func.func @transform_0(%arg0: i32) -> (i32, i32) {
    %c0_i32 = arith.constant 0 : i32
    %c0_i32_0 = arith.constant 0 : i32
    %c0_i32_1 = arith.constant 0 : i32
    return %c0_i32, %c0_i32_0 : i32, i32
  }
  func.func @transform_1(%arg0: i32) -> (i32, i32) {
    %c0_i32 = arith.constant 0 : i32
    %c0_i32_0 = arith.constant 0 : i32
    %c0_i32_1 = arith.constant 0 : i32
    return %c0_i32, %c0_i32_0 : i32, i32
  }
  func.func @transform_2(%arg0: i32) -> (i32, i32, i32) {
    %c0_i32 = arith.constant 0 : i32
    %c0_i32_0 = arith.constant 0 : i32
    %c0_i32_1 = arith.constant 0 : i32
    %c0_i32_2 = arith.constant 0 : i32
    return %c0_i32, %c0_i32_0, %c0_i32_1 : i32, i32, i32
  }
  func.func @transform_3(%arg0: i32) -> (i32, i32) {
    %c0_i32 = arith.constant 0 : i32
    %c0_i32_0 = arith.constant 0 : i32
    %c0_i32_1 = arith.constant 0 : i32
    return %c0_i32, %c0_i32_0 : i32, i32
  }
  func.func @transform_4(%arg0: i32) -> (i32, i32) {
    %c0_i32 = arith.constant 0 : i32
    %c0_i32_0 = arith.constant 0 : i32
    %c0_i32_1 = arith.constant 0 : i32
    return %c0_i32, %c0_i32_0 : i32, i32
  }
  func.func @transform_5(%arg0: i32) -> (i32, i32) {
    %c0_i32 = arith.constant 0 : i32
    %c0_i32_0 = arith.constant 0 : i32
    %c0_i32_1 = arith.constant 0 : i32
    return %c0_i32, %c0_i32_0 : i32, i32
  }
  func.func @transform_6(%arg0: i32) -> (i32, i32) {
    %c0_i32 = arith.constant 0 : i32
    %c0_i32_0 = arith.constant 0 : i32
    %c0_i32_1 = arith.constant 0 : i32
    return %c0_i32, %c0_i32_0 : i32, i32
  }
  func.func @transform_7(%arg0: i32) -> (i32, i32) {
    %c0_i32 = arith.constant 0 : i32
    %c0_i32_0 = arith.constant 0 : i32
    %c0_i32_1 = arith.constant 0 : i32
    return %c0_i32, %c0_i32_0 : i32, i32
  }
  func.func @transform_8(%arg0: i32) -> (i32, i32) {
    %c0_i32 = arith.constant 0 : i32
    %c0_i32_0 = arith.constant 0 : i32
    %c0_i32_1 = arith.constant 0 : i32
    return %c0_i32, %c0_i32_0 : i32, i32
  }
  func.func @transform_9(%arg0: i32) -> (i32, i32) {
    %c0_i32 = arith.constant 0 : i32
    %c0_i32_0 = arith.constant 0 : i32
    %c0_i32_1 = arith.constant 0 : i32
    return %c0_i32, %c0_i32_0 : i32, i32
  }
  func.func @transform_10(%arg0: i32) -> (i32, i32) {
    %c0_i32 = arith.constant 0 : i32
    %c0_i32_0 = arith.constant 0 : i32
    %c0_i32_1 = arith.constant 0 : i32
    return %c0_i32, %c0_i32_0 : i32, i32
  }
  func.func @transform_11(%arg0: i32) -> (i32, i32) {
    %c0_i32 = arith.constant 0 : i32
    %c0_i32_0 = arith.constant 0 : i32
    %c0_i32_1 = arith.constant 0 : i32
    return %c0_i32, %c0_i32_0 : i32, i32
  }
  func.func @transform_12(%arg0: i32) -> (i32, i32, i32) {
    %c0_i32 = arith.constant 0 : i32
    %c0_i32_0 = arith.constant 0 : i32
    %c0_i32_1 = arith.constant 0 : i32
    %c0_i32_2 = arith.constant 0 : i32
    return %c0_i32, %c0_i32_0, %c0_i32_1 : i32, i32, i32
  }
  func.func @transform_13(%arg0: i32) -> (i32, i32, i32) {
    %c0_i32 = arith.constant 0 : i32
    %c0_i32_0 = arith.constant 0 : i32
    %c0_i32_1 = arith.constant 0 : i32
    %c0_i32_2 = arith.constant 0 : i32
    return %c0_i32, %c0_i32_0, %c0_i32_1 : i32, i32, i32
  }
  func.func @transform_14(%arg0: i32) -> (i32, i32) {
    %c0_i32 = arith.constant 0 : i32
    %c0_i32_0 = arith.constant 0 : i32
    %c0_i32_1 = arith.constant 0 : i32
    return %c0_i32, %c0_i32_0 : i32, i32
  }
  func.func @transform_15(%arg0: i32) -> (i32, i32) {
    %c0_i32 = arith.constant 0 : i32
    %c0_i32_0 = arith.constant 0 : i32
    %c0_i32_1 = arith.constant 0 : i32
    return %c0_i32, %c0_i32_0 : i32, i32
  }
  func.func @transform_16(%arg0: i32) -> (i32, i32) {
    %c0_i32 = arith.constant 0 : i32
    %c0_i32_0 = arith.constant 0 : i32
    %c0_i32_1 = arith.constant 0 : i32
    return %c0_i32, %c0_i32_0 : i32, i32
  }
  func.func @transform_17(%arg0: i32) -> (i32, i32) {
    %c0_i32 = arith.constant 0 : i32
    %c0_i32_0 = arith.constant 0 : i32
    %c0_i32_1 = arith.constant 0 : i32
    return %c0_i32, %c0_i32_0 : i32, i32
  }
  func.func @transform_18(%arg0: i32) -> (i32, i32) {
    %c0_i32 = arith.constant 0 : i32
    %c0_i32_0 = arith.constant 0 : i32
    %c0_i32_1 = arith.constant 0 : i32
    return %c0_i32, %c0_i32_0 : i32, i32
  }
  func.func @transform_19(%arg0: i32) -> (i32, i32) {
    %c0_i32 = arith.constant 0 : i32
    %c0_i32_0 = arith.constant 0 : i32
    %c0_i32_1 = arith.constant 0 : i32
    return %c0_i32, %c0_i32_0 : i32, i32
  }
  func.func @transform_20(%arg0: i32) -> (i32, i32, i32) {
    %c0_i32 = arith.constant 0 : i32
    %c0_i32_0 = arith.constant 0 : i32
    %c0_i32_1 = arith.constant 0 : i32
    %c0_i32_2 = arith.constant 0 : i32
    return %c0_i32, %c0_i32_0, %c0_i32_1 : i32, i32, i32
  }
}

</mosaic_0001>

<bundles_post_ra>
// kernel: tpu_custom_call.1
= control target key start
LH: loop header
LB: loop body
LE: loop exit
PB: predicated region body
PF: predicated region fallthrough
CT: control target
= control target key end

     0   :  { %s4860_s0 = inlined_call_operand.hbm [shape: f32[4,16], index: 0, kind: input, shape index: {}]   ;;  %s4861_s1 = inlined_call_operand.hbm [shape: f32[4,16], index: 1, kind: input, shape index: {}]   ;;  %s4862_s2 = inlined_call_operand.vmem [shape: f32[3,4,8], index: 2, kind: input, shape index: {}]   ;;  %s4863_s3 = inlined_call_operand.vmem [shape: f32[16,32], index: 3, kind: input, shape index: {}]   ;;  %s4864_s4 = inlined_call_operand.vmem [shape: f32[1,32], index: 4, kind: input, shape index: {}]   ;;  %s4865_s5 = inlined_call_operand.vmem [shape: f32[32,32], index: 5, kind: input, shape index: {}]   ;;  %s4866_s6 = inlined_call_operand.hbm [shape: f32[1,32], index: 6, kind: input, shape index: {}]   ;;  %s4867_s7 = inlined_call_operand.vmem [shape: f32[32,32], index: 7, kind: input, shape index: {}]   ;;  %s4868_s8 = inlined_call_operand.hbm [shape: f32[1,32], index: 8, kind: input, shape index: {}]   ;;  %s4869_s9 = inlined_call_operand.vmem [shape: f32[16,8], index: 9, kind: input, shape index: {}]   ;;  %s4870_s10 = inlined_call_operand.vmem [shape: f32[32,8], index: 10, kind: input, shape index: {}]   ;;  %s4871_s11 = inlined_call_operand.vmem [shape: f32[1,8], index: 11, kind: input, shape index: {}]   ;;  %s4872_s12 = inlined_call_operand.vmem [shape: f32[4,1,8], index: 12, kind: input, shape index: {}]   ;;  %s4873_s13 = inlined_call_operand.vmem [shape: f32[4,1,8], index: 13, kind: input, shape index: {}]   ;;  %s4874_s14 = inlined_call_operand.vmem [shape: f32[1,8], index: 14, kind: input, shape index: {}]   ;;  %s4875_s15 = inlined_call_operand.vmem [shape: f32[8,32], index: 15, kind: input, shape index: {}]   ;;  %s4876_s16 = inlined_call_operand.vmem [shape: f32[1,32], index: 16, kind: input, shape index: {}]   ;;  %s4877_s17 = inlined_call_operand.vmem [shape: f32[32,8], index: 17, kind: input, shape index: {}]   ;;  %s4878_s18 = inlined_call_operand.vmem [shape: f32[1,8], index: 18, kind: input, shape index: {}]   ;;  %s4879_s19 = inlined_call_operand.vmem [shape: f32[8,16], index: 19, kind: input, shape index: {}]   ;;  %s4880_s20 = inlined_call_operand.hbm [shape: f32[3,4,8], index: 20, kind: output, shape index: {}]  }
   0x1   :  { %4885 = sst [smem:[#allocation15_spill]] %s4860_s0 }
   0x2   :  { %4886 = sst [smem:[#allocation16_spill]] %s4861_s1 }
   0x3   :  { %4887 = sst [smem:[#allocation17_spill]] %s4862_s2 }
   0x4   :  { %4888 = sst [smem:[#allocation18_spill]] %s4863_s3 }
   0x5   :  { %4889 = sst [smem:[#allocation19_spill]] %s4864_s4 }
   0x6   :  { %25 = vsyncpa [#allocation3], 0 }
   0x7   :  { %26 = vsyncpa [#allocation6], 0 }
   0x8   :  { %27 = vsyncpa [#allocation9], 0 }
   0x9   :  { %28 = vsyncpa [#allocation4], 0  ;;  %s4037_s1 = smov [#allocation5]   ;;  %s4038_s23 = smov [#allocation2]  }
   0xa   :  { %s45_s22 = sshll.u32 %s4037_s1, 4  ;;  %s35_s24 = sshll.u32 %s4038_s23, 4  ;;  %s46_s22 = int_to_ptr.vmem [resolvable:$true] %s45_s22  ;;  %s36_s24 = int_to_ptr.vmem [resolvable:$true] %s35_s24 }
   0xb   :  { %s4890_s3 = sld [smem:[#allocation16_spill]] }
  0x11   :  { %s3919_s26 = scalar_lea.hbm %s4890_s3, 64 }
  0x12   :  { %p3920_p0 = scmp.ne.s32.totalorder %s4890_s3, %s3919_s26  ;;  %p3923_p1 = scmp.lt.u32.totalorder %s3919_s26, %s4890_s3 }
  0x14   :  { %p3925_p2 = pnand %p3923_p1, %p3920_p0 }
  0x16   :  { %3928 = shalt.err (!%p3925_p2)
}
  0x17   :  { %s3929_s30 = scalar_lea.vmem %s46_s22, 64  ;;  %p3934_p4 = scmp.lt.s32.totalorder %s46_s22, %s46_s22 }
  0x18   :  { %p3930_p3 = scmp.ne.s32.totalorder %s46_s22, %s3929_s30  ;;  %p3935_p5 = scmp.lt.s32.totalorder %s3929_s30, %s3929_s30 }
  0x1a   :  { %p3936_p6 = por %p3935_p5, %p3934_p4 }
  0x1c   :  { %p3937_p7 = pnand %p3936_p6, %p3930_p3 }
  0x1e   :  { %3940 = shalt.err (!%p3937_p7)
}
  0x1f   :  { %48 = dma.hbm_to_vmem [thread:$0]  %s4890_s3, 64, %s46_s22, [#allocation6]  }
  0x20   :  { %s4891_s2 = sld [smem:[#allocation15_spill]] }
  0x26   :  { %s3941_s25 = scalar_lea.hbm %s4891_s2, 64 }
  0x27   :  { %p3942_p8 = scmp.ne.s32.totalorder %s4891_s2, %s3941_s25  ;;  %p3945_p9 = scmp.lt.u32.totalorder %s3941_s25, %s4891_s2 }
  0x29   :  { %p3947_p10 = pnand %p3945_p9, %p3942_p8 }
  0x2b   :  { %3950 = shalt.err (!%p3947_p10)
}
  0x2c   :  { %s3951_s29 = scalar_lea.vmem %s36_s24, 64  ;;  %p3956_p12 = scmp.lt.s32.totalorder %s36_s24, %s36_s24 }
  0x2d   :  { %p3952_p11 = scmp.ne.s32.totalorder %s36_s24, %s3951_s29  ;;  %p3957_p13 = scmp.lt.s32.totalorder %s3951_s29, %s3951_s29 }
  0x2f   :  { %p3958_p0 = por %p3957_p13, %p3956_p12 }
  0x31   :  { %p3959_p1 = pnand %p3958_p0, %p3952_p11 }
  0x33   :  { %3962 = shalt.err (!%p3959_p1)
}
  0x34   :  { %38 = dma.hbm_to_vmem [thread:$0]  %s4891_s2, 64, %s36_s24, [#allocation3]  }
  0x35   :  { %s4039_s30 = smov [#allocation7]   ;;  %s4040_s21 = smov [#allocation8]  }
  0x36   :  { %s63_s0 = sshll.u32 %s4039_s30, 4  ;;  %s75_s1 = sshll.u32 %s4040_s21, 4  ;;  %s64_s0 = int_to_ptr.vmem [resolvable:$true] %s63_s0  ;;  %s76_s1 = int_to_ptr.vmem [resolvable:$true] %s75_s1 }
  0x37   :  { %s3963_s27 = scalar_lea.hbm %s4866_s6, 16 }
  0x38   :  { %p3964_p2 = scmp.ne.s32.totalorder %s4866_s6, %s3963_s27  ;;  %p3967_p3 = scmp.lt.u32.totalorder %s3963_s27, %s4866_s6 }
  0x3a   :  { %p3969_p4 = pnand %p3967_p3, %p3964_p2 }
  0x3c   :  { %3972 = shalt.err (!%p3969_p4)
}
  0x3d   :  { %s3973_s24 = scalar_lea.vmem %s64_s0, 16  ;;  %s3977_s2 = scalar_lea.vmem %s64_s0, 32 }
  0x3e   :  { %p3974_p5 = scmp.ne.s32.totalorder %s64_s0, %s3973_s24  ;;  %p3978_p6 = scmp.lt.s32.totalorder %s64_s0, %s64_s0 }
  0x3f   :  { %p3979_p7 = scmp.lt.s32.totalorder %s3977_s2, %s3973_s24 }
  0x41   :  { %p3980_p8 = por %p3979_p7, %p3978_p6 }
  0x43   :  { %p3981_p9 = pnand %p3980_p8, %p3974_p5 }
  0x45   :  { %3984 = shalt.err (!%p3981_p9)
}
  0x46   :  { %66 = dma.hbm_to_vmem [thread:$0]  %s4866_s6, 16, %s64_s0, [#allocation6]  }
  0x47   :  { %s3985_s23 = scalar_lea.hbm %s4868_s8, 16 }
  0x48   :  { %p3986_p10 = scmp.ne.s32.totalorder %s4868_s8, %s3985_s23  ;;  %p3989_p11 = scmp.lt.u32.totalorder %s3985_s23, %s4868_s8 }
  0x4a   :  { %p3991_p12 = pnand %p3989_p11, %p3986_p10 }
  0x4c   :  { %3994 = shalt.err (!%p3991_p12)
}
  0x4d   :  { %s3995_s4 = scalar_lea.vmem %s76_s1, 16  ;;  %s3999_s29 = scalar_lea.vmem %s76_s1, 32 }
  0x4e   :  { %p3996_p13 = scmp.ne.s32.totalorder %s76_s1, %s3995_s4  ;;  %p4000_p0 = scmp.lt.s32.totalorder %s76_s1, %s76_s1 }
  0x4f   :  { %p4001_p1 = scmp.lt.s32.totalorder %s3999_s29, %s3995_s4 }
  0x51   :  { %p4002_p2 = por %p4001_p1, %p4000_p0 }
  0x53   :  { %p4003_p3 = pnand %p4002_p2, %p3996_p13 }
  0x55   :  { %4006 = shalt.err (!%p4003_p3)
}
  0x56   :  { %78 = dma.hbm_to_vmem [thread:$0]  %s4868_s8, 16, %s76_s1, [#allocation9]  }
  0x57   :  { %4029 = dma.done.wait [#allocation3], 64  }
  0x58   :  { %4030 = vsyncadd [#allocation3], 4294967232 }
  0x59   :  { %4031 = dma.done.wait [#allocation6], 80  }
  0x5a   :  { %4032 = vsyncadd [#allocation6], 4294967216 }
  0x5b   :  { %4033 = dma.done.wait [#allocation9], 16  }
  0x5c   :  { %4034 = vsyncadd [#allocation9], 4294967280  ;;  %v4041_v0 = vmov 0.0|0.0   ;;  %vm4042_vm0 = vmmov 0   ;;  %v4043_v1 = vmov 0.0   ;;  %s4892_s24 = sld [smem:[#allocation18_spill]] }
  0x5d   :  { %3717 = vmatprep.subr.bf16.mxu1 %v4041_v0  ;;  %3535 = vmatprep.mubr.msk.f32.mxu1 %vm4042_vm0, %v4043_v1  ;;  %v216_v5 = vld [vmem:[#allocation2] sm:$0xf]  ;;  %vm226_vm1 = vcmask 130048   ;;  %v302_v7 = vld [vmem:[%s4865_s5 + $0x8] sm:$0xff]  ;;  %v303_v11 = vld [vmem:[%s4865_s5 + $0x10] sm:$0xff]  ;;  %s4893_s3 = sld [smem:[#allocation19_spill]] }
  0x5e   :  { %3726 = vmatprep.subr.bf16.mxu0 %v4041_v0  ;;  %3557 = vmatprep.mubr.msk.f32.mxu0 %vm4042_vm0, %v4043_v1  ;;  %v301_v6 = vld [vmem:[%s4865_s5] sm:$0xff]  ;;  %v388_v10 = vld [vmem:[%s4867_s7 + $0x8] sm:$0xff]  ;;  %v304_v12 = vld [vmem:[%s4865_s5 + $0x18] sm:$0xff]  ;;  %vm312_vm2 = vcmask 261120   ;;  %v4044_v57 = vmov 683565275  }
  0x5f   :  { %v387_v8 = vld [vmem:[%s4867_s7] sm:$0xff]  ;;  %v3721_v9 = vpack.c.bf16 %v302_v7, %v301_v6  ;;  %v389_v14 = vld [vmem:[%s4867_s7 + $0x10] sm:$0xff]  ;;  %v390_v15 = vld [vmem:[%s4867_s7 + $0x18] sm:$0xff]  ;;  %v3724_v16 = vpack.c.bf16 %v304_v12, %v303_v11  ;;  %v4045_v59 = vmov 2475754826   ;;  %s4050_s0 = smov 1  }
  0x60   :  { %v3727_v13 = vpack.c.bf16 %v388_v10, %v387_v8  ;;  %v3730_v17 = vpack.c.bf16 %v390_v15, %v389_v14  ;;  %v115_v23 = vld [vmem:[%s4870_s10] sm:$0xff]  ;;  %v116_v24 = vld [vmem:[%s4870_s10 + $0x8] sm:$0xff]  ;;  %v117_v28 = vld [vmem:[%s4870_s10 + $0x10] sm:$0xff]  ;;  %v4046_v62 = vmov 2131351028   ;;  %s4894_s4 = sld [smem:[#allocation17_spill]] }
  0x61   :  { %v113_v25 = vld [vmem:[%s4869_s9] sm:$0xff]  ;;  %v4272_v26 = vpack.c.bf16 %v116_v24, %v115_v23  ;;  %v114_v27 = vld [vmem:[%s4869_s9 + $0x8] sm:$0xff]  ;;  %v118_v29 = vld [vmem:[%s4870_s10 + $0x18] sm:$0xff]  ;;  %v4048_v6 = vmov 920167782   ;;  %s4052_s9 = smov 2  }
  0x62   :  { %v217_v2 = vld [vmem:[%s4892_s24] sm:$0xff]  ;;  %v218_v3 = vld [vmem:[%s4892_s24 + $0x8] sm:$0xff]  ;;  %3728 = vmatpush3.bf16.msra.mxu0 %v3727_v13  ;;  %v4283_v30 = vpack.c.bf16 %v114_v27, %v113_v25  ;;  %v4286_v31 = vpack.c.bf16 %v118_v29, %v117_v28  ;;  %s4053_s10 = smov 4  }
  0x63   :  { %v3718_v4 = vpack.c.bf16 %v218_v3, %v217_v2  ;;  %3729 = vmatprep.subr.bf16.mxu0 %v4041_v0  ;;  %v3384_v18 = vld [vmem:[%s4893_s3] ss:$0 sm:$0xff]  ;;  %v469_v32 = vld [vmem:[#allocation5] sm:$0xf]  ;;  %v3386_v33 = vld [vmem:[#allocation7] ss:$0 sm:$0xff] }
  0x64   :  { %v4304_v42 = vld [vmem:[%s4871_s11] ss:$0 sm:$0xff]  ;;  %v4047_v3 = vmov 2102212464  }
  0x65   :  { %3719 = vmatpush3.bf16.msra.mxu1 %v3718_v4 }
  0x66   :  { %3720 = vmatprep.subr.bf16.mxu1 %v4041_v0  ;;  %3731 = vmatpush3.bf16.msra.mxu0 %v3730_v17 }
  0x67   :  { %3738 = vmatprep.subr.bf16.mxu0 %v4041_v0 }
  0x68   :  { %3536 = vmatmul.mubr.msk.f32.vlgmr.msra.gmra.mrb[0].mxu1 %vm226_vm1, %v216_v5 }
  0x69   :  { %3546 = vmatprep.mubr.msk.f32.mxu1 %vm4042_vm0, %v4043_v1  ;;  %3722 = vmatpush3.bf16.msra.mxu1 %v3721_v9  ;;  %v4049_v9 = vmov 1326507024  }
  0x6a   :  { %3723 = vmatprep.subr.bf16.mxu1 %v4041_v0 }
  0x6d   :  { %3725 = vmatpush3.bf16.msra.mxu1 %v3724_v16 }
  0x6e   :  { %3732 = vmatprep.subr.bf16.mxu1 %v4041_v0 }
 0x13b   :  { %v296_v19 = vpop.f32.mrb[0].mxu1 }
 0x13c   :  { %v297_v20 = vadd.f32 %v3384_v18, %v296_v19  ;;  %v3537_v21 = vpop.f32.mrb[1].mxu1 }
 0x13e   :  { %3828 = vtanh.f32 %v297_v20 }
 0x148   :  { %v3829_v22 = vpop.eup %3828 }
 0x149   :  { %3547 = vmatmul.mubr.msk.f32.vlgmr.msra.gmra.mrb[2].mxu1 %vm312_vm2, %v3829_v22  ;;  %3558 = vmatmul.mubr.msk.f32.vlgmr.msra.gmra.mrb[0].mxu0 %vm312_vm2, %v3829_v22 }
 0x14a   :  { %3575 = vmatprep.mubr.msk.f32.mxu0 %vm4042_vm0, %v4043_v1  ;;  %3568 = vmatprep.mubr.msk.f32.mxu1 %vm4042_vm0, %v4043_v1 }
 0x14b   :  { %3734 = vmatpush3.bf16.msra.mxu1 %v4272_v26  ;;  %3740 = vmatpush3.bf16.msra.mxu0 %v4283_v30 }
 0x14c   :  { %3735 = vmatprep.subr.bf16.mxu1 %v4041_v0  ;;  %3578 = vmatprep.subr.mxu0 %v4043_v1 }
 0x14e   :  { %3576 = vmatmul.mubr.msk.f32.vlgmr.msra.gmra.mrb[2].mxu0 %vm226_vm1, %v469_v32 }
 0x14f   :  { %3737 = vmatpush3.bf16.msra.mxu1 %v4286_v31  ;;  %3580 = vmatprep.mubr.msk.f32.mxu0 %vm4042_vm0, %v4043_v1 }
 0x150   :  { %3583 = vmatprep.subr.mxu1 %v4043_v1 }
 0x21c   :  { %v382_v34 = vpop.f32.mrb[2].mxu1  ;;  %v4296_v35 = vpop.f32.mrb[0].mxu0 }
 0x21d   :  { %v383_v36 = vadd.f32 %v3386_v33, %v382_v34  ;;  %v3548_v37 = vpop.f32.mrb[3].mxu1  ;;  %v3559_v38 = vpop.f32.mrb[1].mxu0 }
 0x21f   :  { %3830 = vtanh.f32 %v383_v36 }
 0x221   :  { %v612_v40 = vpop.f32.mrb[2].mxu0 }
 0x222   :  { %v3577_v41 = vpop.f32.mrb[3].mxu0 }
 0x229   :  { %v3831_v39 = vpop.eup %3830 }
 0x22a   :  { %3569 = vmatmul.mubr.msk.f32.vlgmr.msra.gmra.mrb[4].mxu1 %vm312_vm2, %v3831_v39 }
 0x22b   :  { %3585 = vmatprep.mubr.msk.f32.mxu1 %vm4042_vm0, %v4043_v1 }
 0x2fd   :  { %v539_v43 = vpop.f32.mrb[4].mxu1 }
 0x2fe   :  { %v613_v44 = vadd.f32 %v612_v40, %v539_v43  ;;  %v3570_v45 = vpop.f32.mrb[5].mxu1 }
 0x300   :  { %v4307_v46 = vadd.f32 %v4304_v42, %v613_v44 }
 0x302   :  { %v620_v47 = vand.u32 2139095040, %v4307_v46  ;;  %v617_v51 = vand.u32 2147483647, %v4307_v46  ;;  %vm619_vm10 = vcmp.lt.s32.totalorder %v4307_v46, 0 }
 0x304   :  { %v621_v48 = vshrl.u32 %v620_v47, 23  ;;  %v624_v54 = vand.u32 8388607, %v617_v51  ;;  %vm618_vm11 = vcmp.le.f32.partialorder %v617_v51, 0.7853982 }
 0x305   :  { %v4346_v51 = vld [vmem:[%s4872_s12 + $0x2] ss:$0 sm:$0xff] }
 0x306   :  { %v3392_v49 = vadd.s32 4294967169, %v621_v48  ;;  %v625_v11 = vor.u32 8388608, %v624_v54 }
 0x308   :  { %v627_v50 = vadd.s32 1, %v3392_v49  ;;  %v665_v25 = vshll.u32 %v625_v11, 8 }
 0x30a   :  { %vm628_vm3 = vcmp.gt.s32.totalorder %v627_v50, 0 }
 0x30b   :  { %v629_v52 = vsel %vm628_vm3, %v627_v50, 0 }
 0x30c   :  { %v631_v53 = vand.u32 31, %v629_v52  ;;  %v630_v56 = vshrl.u32 %v629_v52, 5 }
 0x30e   :  { %v632_v55 = vsub.s32 32, %v631_v53  ;;  %v634_v58 = vshll.u32 %v4044_v57, %v631_v53  ;;  %v637_v60 = vshll.u32 %v4045_v59, %v631_v53  ;;  %v640_v2 = vshll.u32 %v4046_v62, %v631_v53 }
 0x30f   :  { %v643_v5 = vshll.u32 %v4047_v3, %v631_v53  ;;  %v646_v8 = vshll.u32 %v4048_v6, %v631_v53  ;;  %vm649_vm4 = vcmp.lt.s32.totalorder %v630_v56, 1  ;;  %vm652_vm5 = vcmp.lt.s32.totalorder %v630_v56, 4 }
 0x310   :  { %v635_v61 = vshrl.u32 %v4045_v59, %v632_v55  ;;  %v638_v63 = vshrl.u32 %v4046_v62, %v632_v55  ;;  %v641_v4 = vshrl.u32 %v4047_v3, %v632_v55  ;;  %v644_v7 = vshrl.u32 %v4048_v6, %v632_v55 }
 0x311   :  { %v647_v10 = vshrl.u32 %v4049_v9, %v632_v55  ;;  %v633_v20 = vshrl.u32 %v4044_v57, %v632_v55  ;;  %vm651_vm6 = vcmp.lt.s32.totalorder %v630_v56, 3  ;;  %vm650_vm7 = vcmp.lt.s32.totalorder %v630_v56, 2 }
 0x312   :  { %v636_v12 = vor.u32 %v635_v61, %v634_v58  ;;  %v639_v13 = vor.u32 %v638_v63, %v637_v60  ;;  %v642_v14 = vor.u32 %v641_v4, %v640_v2  ;;  %v645_v15 = vor.u32 %v644_v7, %v643_v5 }
 0x313   :  { %v648_v16 = vor.u32 %v647_v10, %v646_v8 }
 0x314   :  { %v654_v17 = vsel %vm652_vm5, %v642_v14, 2102212464  ;;  %v657_v18 = vsel %vm649_vm4, %v636_v12, %v639_v13  ;;  %v661_v19 = vsel %vm649_vm4, %v639_v13, %v642_v14  ;;  %v658_v21 = vsel %vm652_vm5, %v645_v15, 920167782 }
 0x315   :  { %v662_v22 = vsel %vm652_vm5, %v648_v16, 1326507024  ;;  %v659_v23 = vsel %vm651_vm6, %v642_v14, %v658_v21  ;;  %v653_v27 = vsel %vm649_vm4, %v633_v20, %v636_v12  ;;  %v655_v28 = vsel %vm651_vm6, %v639_v13, %v654_v17 }
 0x316   :  { %v663_v24 = vsel %vm651_vm6, %v645_v15, %v662_v22  ;;  %v660_v29 = vsel %vm650_vm7, %v657_v18, %v659_v23  ;;  %v656_v38 = vsel %vm650_vm7, %v653_v27, %v655_v28  ;;  %v4341_v22 = vld [vmem:[%s4874_s14] ss:$0 sm:$0xff]  ;;  %vm709_vm5 = vweird.f32 %v4307_v46 }
 0x317   :  { %v664_v32 = vsel %vm650_vm7, %v661_v19, %v663_v24  ;;  %v4327_v36 = vmul.u32.u64.low %v665_v25, %v660_v29  ;;  %v4328_v37 = vmul.u32.u64.high %v665_v25, %v660_v29, %v4327_v36  ;;  %v672_v40 = vmul.u32 %v665_v25, %v656_v38  ;;  %v4356_v29 = vld [vmem:[%s4872_s12] ss:$0 sm:$0xff] }
 0x318   :  { %v4324_v33 = vmul.u32.u64.low %v665_v25, %v664_v32  ;;  %v4325_v34 = vmul.u32.u64.high %v665_v25, %v664_v32, %v4324_v33  ;;  %v4351_v25 = vld [vmem:[%s4873_s13 + $0x2] ss:$0 sm:$0xff]  ;;  %vm833_vm6 = vcmask 7168   ;;  %vm840_vm7 = vcmask 15360  }
 0x319   :  { %v675_v39 = vadd.s32 1, %v4328_v37 }
 0x31a   :  { %vm674_vm8 = vc.u32 %v4325_v34, %v4327_v36  ;;  %v673_v55 = vadd.s32 %v4327_v36, %v4325_v34  ;;  %v4361_v34 = vld [vmem:[%s4873_s13] ss:$0 sm:$0xff]  ;;  %v4366_v36 = vld [vmem:[%s4872_s12 + $0x3] ss:$0 sm:$0xff] }
 0x31b   :  { %v676_v41 = vsel %vm674_vm8, %v675_v39, %v4328_v37  ;;  %v4372_v39 = vld [vmem:[%s4873_s13 + $0x3] ss:$0 sm:$0xff]  ;;  %vm847_vm8 = vcmask 31744  }
 0x31c   :  { %v677_v43 = vadd.s32 %v676_v41, %v672_v40  ;;  %v4377_v40 = vld [vmem:[%s4872_s12 + $0x1] ss:$0 sm:$0xff] }
 0x31d   :  { %v4382_v41 = vld [vmem:[%s4873_s13 + $0x1] ss:$0 sm:$0xff] }
 0x31e   :  { %v678_v44 = vadd.s32 536870912, %v677_v43 }
 0x320   :  { %v679_v45 = vshrl.u32 %v678_v44, 30 }
 0x322   :  { %v680_v47 = vshll.u32 %v679_v45, 30  ;;  %v703_v11 = vsub.s32 4, %v679_v45 }
 0x324   :  { %v681_v48 = vsub.s32 %v677_v43, %v680_v47  ;;  %v704_v14 = vsel %vm619_vm10, %v703_v11, %v679_v45  ;;  %v4385_v43 = vsub.f32 1.0, %v4341_v22 }
 0x325   :  { %v706_v16 = vsel %vm618_vm11, 0, %v704_v14  ;;  %v4051_v14 = vmov 0  }
 0x326   :  { %v683_v49 = vsub.s32 0, %v681_v48  ;;  %v813_v17 = vadd.s32 3, %v706_v16  ;;  %v710_v18 = vand.u32 3, %v706_v16  ;;  %3809 = vset.pattern.permute.xlu0 %v4051_v14  ;;  %3810 = vset.pattern.permute.xlu1 %v4051_v14 }
 0x328   :  { %v3393_v50 = vmin.u32 %v683_v49, %v681_v48  ;;  %v814_v19 = vand.u32 3, %v813_v17  ;;  %vm715_vm12 = vcmp.eq.s32.totalorder %v710_v18, 2  ;;  %vm712_vm14 = vcmp.eq.s32.totalorder %v710_v18, 0 }
 0x329   :  { %vm711_vm3 = vcmp.lt.s32.totalorder %v710_v18, 2 }
 0x32a   :  { %v685_v52 = vclz %v3393_v50  ;;  %vm819_vm13 = vcmp.eq.s32.totalorder %v814_v19, 2  ;;  %vm816_vm15 = vcmp.eq.s32.totalorder %v814_v19, 0  ;;  %vm815_vm4 = vcmp.lt.s32.totalorder %v814_v19, 2 }
 0x32c   :  { %v3394_v53 = vadd.s32 4294967294, %v685_v52 }
 0x32e   :  { %vm3395_vm9 = vcmp.lt.s32.totalorder %v3394_v53, 0 }
 0x32f   :  { %v688_v54 = vsel %vm3395_vm9, 0, %v3394_v53  ;;  %vm975_vm9 = vcmask 64512  }
 0x330   :  { %v689_v56 = vsub.s32 32, %v688_v54  ;;  %v693_v58 = vsub.s32 4294967266, %v688_v54  ;;  %v690_v60 = vshll.u32 %v681_v48, %v688_v54 }
 0x332   :  { %v691_v61 = vshrl.u32 %v673_v55, %v689_v56  ;;  %v694_v63 = vadd.s32 127, %v693_v58 }
 0x334   :  { %v692_v2 = vor.u32 %v691_v61, %v690_v60  ;;  %v695_v4 = vshll.u32 %v694_v63, 23 }
 0x336   :  { %v696_v5 = vor.u32 4788187, %v695_v4  ;;  %v699_v8 = vcvt.s32.f32 %v692_v2 }
 0x338   :  { %v697_v7 = vand.u32 2147483647, %v696_v5 }
 0x33a   :  { %v700_v10 = vmul.f32 %v699_v8, %v697_v7 }
 0x33c   :  { %v701_v12 = vxor.u32 2147483648, %v700_v10 }
 0x33e   :  { %v702_v13 = vsel %vm619_vm10, %v701_v12, %v700_v10  ;;  %vm1367_vm10 = vcmask 60416  }
 0x33f   :  { %v705_v15 = vsel %vm618_vm11, %v4307_v46, %v702_v13 }
 0x340   :  { %3832 = vcosq.f32 %v705_v15 }
 0x341   :  { %3834 = vsinq.f32 %v705_v15 }
 0x34a   :  { %v3833_v20 = vpop.eup %3832 }
 0x34b   :  { %v3835_v21 = vpop.eup %3834  ;;  %v716_v23 = vxor.u32 2147483648, %v3833_v20 }
 0x34c   :  { %v713_v24 = vxor.u32 2147483648, %v3835_v21 }
 0x34d   :  { %v717_v27 = vsel %vm715_vm12, %v716_v23, %v3835_v21  ;;  %v821_v28 = vsel %vm819_vm13, %v716_v23, %v3835_v21 }
 0x34e   :  { %v714_v32 = vsel %vm712_vm14, %v3833_v20, %v713_v24  ;;  %v818_v33 = vsel %vm816_vm15, %v3833_v20, %v713_v24 }
 0x34f   :  { %v718_v37 = vsel %vm711_vm3, %v714_v32, %v717_v27  ;;  %v822_v38 = vsel %vm815_vm4, %v818_v33, %v821_v28 }
 0x350   :  { %v719_v46 = vsel %vm709_vm5, nan, %v718_v37  ;;  %v823_v44 = vsel %vm709_vm5, nan, %v822_v38 }
 0x351   :  { %v901_v45 = vmul.f32 %v4346_v51, %v719_v46  ;;  %v902_v47 = vmul.f32 %v4351_v25, %v823_v44  ;;  %v824_v48 = vmul.f32 %v4356_v29, %v719_v46  ;;  %v825_v49 = vmul.f32 %v4361_v34, %v823_v44 }
 0x352   :  { %v938_v50 = vmul.f32 %v4366_v36, %v719_v46  ;;  %v939_v52 = vmul.f32 %v4372_v39, %v823_v44  ;;  %v864_v53 = vmul.f32 %v4377_v40, %v719_v46  ;;  %v865_v54 = vmul.f32 %v4382_v41, %v823_v44 }
 0x353   :  { %v4395_v55 = vsub.f32 %v901_v45, %v902_v47  ;;  %v826_v56 = vsub.f32 %v824_v48, %v825_v49 }
 0x354   :  { %v4397_v58 = vsub.f32 %v938_v50, %v939_v52  ;;  %v866_v60 = vsub.f32 %v864_v53, %v865_v54  ;;  %v4054_v50 = vmov 7  }
 0x355   :  { %v904_v61 = vmul.f32 %v4395_v55, %v4385_v43  ;;  %v827_v63 = vmul.f32 %v826_v56, %v4385_v43 }
 0x356   :  { %v941_v5 = vmul.f32 %v4397_v58, %v4385_v43  ;;  %v867_v7 = vmul.f32 %v866_v60, %v4385_v43 }
 0x357   :  { %v905_v2 = vadd.f32 %v4341_v22, %v904_v61  ;;  %v828_v4 = vadd.f32 %v4341_v22, %v827_v63 }
 0x358   :  { %v942_v8 = vadd.f32 %v4341_v22, %v941_v5  ;;  %v868_v10 = vadd.f32 %v4341_v22, %v867_v7 }
 0x359   :  { %907 = vrot.lane.b32.xlu1 %v905_v2, %s4050_s0  ;;  %830 = vrot.lane.b32.xlu0 %v828_v4, %s4050_s0 }
 0x35d   :  { %944 = vrot.lane.b32.xlu1 %v942_v8, %s4050_s0  ;;  %870 = vrot.lane.b32.xlu0 %v868_v10, %s4050_s0 }
 0x3cb   :  { %v908_v11 = vpop.permute.xlu1 %907  ;;  %v831_v12 = vpop.permute.xlu0 %830 }
 0x3cc   :  { %v834_v13 = vsel %vm833_vm6, 1.0, %v831_v12  ;;  %v910_v16 = vsel %vm833_vm6, 1.0, %v908_v11 }
 0x3cd   :  { %v835_v15 = vmul.f32 %v834_v13, %v828_v4  ;;  %v911_v20 = vmul.f32 %v910_v16, %v905_v2 }
 0x3cf   :  { %v945_v17 = vpop.permute.xlu1 %944  ;;  %837 = vrot.lane.b32.xlu0 %v835_v15, %s4052_s9  ;;  %v871_v18 = vpop.permute.xlu0 %870 }
 0x3d0   :  { %v873_v19 = vsel %vm833_vm6, 1.0, %v871_v18  ;;  %v947_v23 = vsel %vm833_vm6, 1.0, %v945_v17 }
 0x3d1   :  { %v874_v21 = vmul.f32 %v873_v19, %v868_v10  ;;  %v948_v24 = vmul.f32 %v947_v23, %v942_v8 }
 0x3d3   :  { %913 = vrot.lane.b32.xlu0 %v911_v20, %s4052_s9  ;;  %876 = vrot.lane.b32.xlu1 %v874_v21, %s4052_s9 }
 0x3d7   :  { %950 = vrot.lane.b32.xlu1 %v948_v24, %s4052_s9 }
 0x441   :  { %v838_v27 = vpop.permute.xlu0 %837 }
 0x442   :  { %v841_v28 = vsel %vm840_vm7, 1.0, %v838_v27 }
 0x443   :  { %v842_v32 = vmul.f32 %v841_v28, %v835_v15 }
 0x445   :  { %v877_v33 = vpop.permute.xlu1 %876  ;;  %844 = vrot.lane.b32.xlu0 %v842_v32, %s4053_s10  ;;  %v914_v37 = vpop.permute.xlu0 %913 }
 0x446   :  { %v879_v38 = vsel %vm840_vm7, 1.0, %v877_v33  ;;  %v916_v46 = vsel %vm840_vm7, 1.0, %v914_v37 }
 0x447   :  { %v880_v44 = vmul.f32 %v879_v38, %v874_v21  ;;  %v917_v45 = vmul.f32 %v916_v46, %v911_v20 }
 0x449   :  { %882 = vrot.lane.b32.xlu1 %v880_v44, %s4053_s10  ;;  %v951_v47 = vpop.permute.xlu1 %950  ;;  %919 = vrot.lane.b32.xlu0 %v917_v45, %s4053_s10 }
 0x44a   :  { %v953_v48 = vsel %vm840_vm7, 1.0, %v951_v47 }
 0x44b   :  { %v954_v49 = vmul.f32 %v953_v48, %v948_v24  ;;  %v120_v48 = vld [vmem:[%s4877_s17] sm:$0xff] }
 0x44d   :  { %956 = vrot.lane.b32.xlu1 %v954_v49, %s4053_s10  ;;  %858 = vperm.xlu0 %3809, %v826_v56   ;;  %v4438_v56 = vld [vmem:[%s4875_s15] sm:$0xff] }
 0x44e   :  { %3579 = vmatpush3.msra.mxu0 %v4438_v56  ;;  %3584 = vmatpush3.msra.mxu1 %v4438_v56 }
 0x44f   :  { %3588 = vmatprep.subr.mxu0 %v4043_v1  ;;  %3593 = vmatprep.subr.mxu1 %v4043_v1 }
 0x451   :  { %895 = vperm.xlu1 %3810, %v866_v60   ;;  %3812 = vset.pattern.permute.xlu0 %v4054_v50 }
 0x455   :  { %3811 = vset.pattern.permute.xlu1 %v4054_v50 }
 0x4b7   :  { %v845_v52 = vpop.permute.xlu0 %844 }
 0x4b8   :  { %v848_v53 = vsel %vm847_vm8, 1.0, %v845_v52  ;;  %v122_v52 = vld [vmem:[%s4877_s17 + $0x10] sm:$0xff] }
 0x4b9   :  { %v849_v54 = vmul.f32 %v848_v53, %v842_v32 }
 0x4bb   :  { %v883_v61 = vpop.permute.xlu1 %882  ;;  %852 = vperm.xlu1 %3811, %v849_v54   ;;  %v920_v63 = vpop.permute.xlu0 %919 }
 0x4bc   :  { %v885_v2 = vsel %vm847_vm8, 1.0, %v883_v61  ;;  %v922_v60 = vsel %vm847_vm8, 1.0, %v920_v63  ;;  %v4499_v63 = vld [vmem:[%s4876_s16] ss:$0 sm:$0xff] }
 0x4bd   :  { %v886_v4 = vmul.f32 %v885_v2, %v880_v44  ;;  %v923_v5 = vmul.f32 %v922_v60, %v917_v45 }
 0x4bf   :  { %889 = vperm.xlu0 %3812, %v886_v4   ;;  %3813 = vset.pattern.permute.xlu1 %v4051_v14  ;;  %v957_v7 = vpop.permute.xlu1 %956 }
 0x4c0   :  { %932 = vperm.xlu1 %3813, %v4395_v55   ;;  %v959_v8 = vsel %vm847_vm8, 1.0, %v957_v7 }
 0x4c1   :  { %v960_v10 = vmul.f32 %v959_v8, %v954_v49  ;;  %v121_v49 = vld [vmem:[%s4877_s17 + $0x8] sm:$0xff] }
 0x4c2   :  { %v4485_v53 = vpack.c.bf16 %v121_v49, %v120_v48  ;;  %v4517_v49 = vld [vmem:[%s4878_s18] ss:$0 sm:$0xff] }
 0x4c3   :  { %926 = vperm.xlu0 %3812, %v923_v5  }
 0x4c4   :  { %969 = vperm.xlu1 %3813, %v4397_v58  }
 0x4c7   :  { %3815 = vset.pattern.permute.xlu0 %v4051_v14 }
 0x4c8   :  { %3814 = vset.pattern.permute.xlu1 %v4054_v50 }
 0x4c9   :  { %963 = vperm.xlu1 %3814, %v960_v10  }
 0x4cc   :  { %v859_v55 = vpop.permute.xlu0 %858 }
 0x4cd   :  { %3816 = vset.pattern.permute.xlu1 %v4051_v14  ;;  %v861_v12 = vmul.f32 %v859_v55, %v849_v54  ;;  %v123_v54 = vld [vmem:[%s4877_s17 + $0x18] sm:$0xff] }
 0x4ce   :  { %v4491_v61 = vpack.c.bf16 %v123_v54, %v122_v52  ;;  %v1365_v54 = vld [vmem:[%s4894_s4] sm:$0xf] }
 0x4cf   :  { %v862_v15 = vmul.f32 %v861_v12, %v4385_v43 }
 0x4d0   :  { %v896_v11 = vpop.permute.xlu1 %895 }
 0x4d1   :  { %v898_v16 = vmul.f32 %v896_v11, %v886_v4 }
 0x4d3   :  { %v899_v19 = vmul.f32 %v898_v16, %v4385_v43 }
 0x53a   :  { %v853_v13 = vpop.permute.xlu1 %852 }
 0x53b   :  { %v855_v17 = vmul.f32 %v4341_v22, %v853_v13 }
 0x53d   :  { %v863_v18 = vadd.f32 %v862_v15, %v855_v17  ;;  %v3388_v15 = vld [vmem:[#allocation8] ss:$0 sm:$0xff] }
 0x53e   :  { %v890_v58 = vpop.permute.xlu0 %889 }
 0x53f   :  { %v892_v20 = vmul.f32 %v4341_v22, %v890_v58  ;;  %v933_v21 = vpop.permute.xlu1 %932  ;;  %3581 = vmatmul.mubr.msk.f32.vlgmr.msra.gmra.mrb[4].mxu0 %vm975_vm9, %v863_v18 }
 0x540   :  { %v935_v23 = vmul.f32 %v933_v21, %v923_v5  ;;  %3589 = vmatpush3.msra.mxu0 %v4438_v56  ;;  %3590 = vmatprep.mubr.msk.f32.mxu0 %vm4042_vm0, %v4043_v1 }
 0x541   :  { %v900_v24 = vadd.f32 %v899_v19, %v892_v20  ;;  %3741 = vmatprep.subr.bf16.mxu0 %v4041_v0  ;;  %v465_v20 = vadd.f32 %v3388_v15, %v4296_v35 }
 0x542   :  { %v936_v27 = vmul.f32 %v935_v23, %v4385_v43  ;;  %v927_v28 = vpop.permute.xlu0 %926 }
 0x543   :  { %v929_v32 = vmul.f32 %v4341_v22, %v927_v28  ;;  %v970_v33 = vpop.permute.xlu1 %969  ;;  %3586 = vmatmul.mubr.msk.f32.vlgmr.msra.gmra.mrb[6].mxu1 %vm975_vm9, %v900_v24 }
 0x544   :  { %3594 = vmatpush3.msra.mxu1 %v4438_v56  ;;  %3595 = vmatprep.mubr.msk.f32.mxu1 %vm4042_vm0, %v4043_v1  ;;  %v972_v38 = vmul.f32 %v970_v33, %v960_v10 }
 0x545   :  { %v937_v37 = vadd.f32 %v936_v27, %v929_v32  ;;  %3609 = vmatprep.subr.mxu1 %v4043_v1 }
 0x546   :  { %v973_v44 = vmul.f32 %v972_v38, %v4385_v43 }
 0x547   :  { %3591 = vmatmul.mubr.msk.f32.vlgmr.msra.gmra.mrb[6].mxu0 %vm975_vm9, %v937_v37 }
 0x548   :  { %v964_v46 = vpop.permute.xlu1 %963  ;;  %3606 = vmatprep.mubr.msk.f32.mxu0 %vm4042_vm0, %v4043_v1  ;;  %3743 = vmatpush3.bf16.msra.mxu0 %v4485_v53 }
 0x549   :  { %v966_v45 = vmul.f32 %v4341_v22, %v964_v46  ;;  %3744 = vmatprep.subr.bf16.mxu0 %v4041_v0 }
 0x54b   :  { %v974_v47 = vadd.f32 %v973_v44, %v966_v45 }
 0x54c   :  { %3746 = vmatpush3.bf16.msra.mxu0 %v4491_v61 }
 0x54d   :  { %3596 = vmatmul.mubr.msk.f32.vlgmr.msra.gmra.mrb[8].mxu1 %vm975_vm9, %v974_v47  ;;  %3753 = vmatprep.subr.bf16.mxu0 %v4041_v0 }
 0x54e   :  { %3611 = vmatprep.mubr.msk.f32.mxu1 %vm4042_vm0, %v4043_v1 }
 0x612   :  { %v1045_v2 = vpop.f32.mrb[4].mxu0 }
 0x613   :  { %v1046_v4 = vadd.f32 %v4499_v63, %v1045_v2  ;;  %v3582_v60 = vpop.f32.mrb[5].mxu0 }
 0x615   :  { %v3404_v5 = vmul.f32 -1.442695, %v1046_v4 }
 0x616   :  { %v1118_v7 = vpop.f32.mrb[6].mxu1 }
 0x617   :  { %3836 = vpow2.f32 %v3404_v5  ;;  %v1119_v8 = vadd.f32 %v4499_v63, %v1118_v7  ;;  %v3587_v10 = vpop.f32.mrb[7].mxu1 }
 0x619   :  { %v3405_v55 = vmul.f32 -1.442695, %v1119_v8 }
 0x61a   :  { %v1191_v11 = vpop.f32.mrb[6].mxu0 }
 0x61b   :  { %3838 = vpow2.f32 %v3405_v55  ;;  %v3592_v12 = vpop.f32.mrb[7].mxu0  ;;  %v1192_v13 = vadd.f32 %v4499_v63, %v1191_v11 }
 0x61c   :  { %v4528_v12 = vld [vmem:[%s4879_s19] sm:$0xff] }
 0x61d   :  { %3840 = vtanh.f32 %v1192_v13  ;;  %3610 = vmatpush3.msra.mxu1 %v4528_v12 }
 0x61e   :  { %3747 = vmatprep.subr.bf16.mxu1 %v4041_v0 }
 0x620   :  { %v1264_v16 = vpop.f32.mrb[8].mxu1 }
 0x621   :  { %v3837_v17 = vpop.eup %3836  ;;  %v1265_v18 = vadd.f32 %v4499_v63, %v1264_v16  ;;  %v3597_v58 = vpop.f32.mrb[9].mxu1 }
 0x622   :  { %v1271_v19 = vadd.f32 1.0, %v3837_v17 }
 0x623   :  { %v3406_v21 = vmul.f32 -1.442695, %v1265_v18 }
 0x624   :  { %3842 = vrcp.f32 %v1271_v19 }
 0x625   :  { %v3839_v23 = vpop.eup %3838  ;;  %3844 = vpow2.f32 %v3406_v21 }
 0x626   :  { %v1277_v24 = vadd.f32 1.0, %v3839_v23  ;;  %3846 = vtanh.f32 %v465_v20 }
 0x627   :  { %v3841_v27 = vpop.eup %3840 }
 0x628   :  { %3848 = vrcp.f32 %v1277_v24 }
 0x62e   :  { %v3843_v28 = vpop.eup %3842 }
 0x62f   :  { %v3845_v32 = vpop.eup %3844  ;;  %v1288_v33 = vmul.f32 %v3843_v28, %v3841_v27 }
 0x630   :  { %v3847_v37 = vpop.eup %3846  ;;  %v1284_v46 = vadd.f32 1.0, %v3845_v32 }
 0x632   :  { %v3849_v38 = vpop.eup %3848  ;;  %3850 = vrcp.f32 %v1284_v46 }
 0x633   :  { %v1287_v44 = vmul.f32 %v3849_v38, %v3847_v37 }
 0x635   :  { %v4506_v45 = vadd.f32 %v1288_v33, %v1287_v44 }
 0x637   :  { %3852 = vtanh.f32 %v4506_v45 }
 0x63c   :  { %v3851_v35 = vpop.eup %3850 }
 0x641   :  { %v3853_v47 = vpop.eup %3852 }
 0x642   :  { %v1291_v48 = vmul.f32 %v3853_v47, %v3851_v35 }
 0x644   :  { %3607 = vmatmul.mubr.msk.f32.vlgmr.msra.gmra.mrb[8].mxu0 %vm312_vm2, %v1291_v48 }
 0x645   :  { %3755 = vmatpush3.bf16.msra.mxu0 %v4283_v30  ;;  %3629 = vmatprep.mubr.msk.f32.mxu0 %vm4042_vm0, %v4043_v1 }
 0x646   :  { %3632 = vmatprep.subr.mxu0 %v4043_v1 }
 0x717   :  { %v1361_v52 = vpop.f32.mrb[8].mxu0 }
 0x718   :  { %v1362_v2 = vadd.f32 %v4517_v49, %v1361_v52  ;;  %v3608_v4 = vpop.f32.mrb[9].mxu0 }
 0x71a   :  { %v1366_v60 = vadd.f32 %v1365_v54, %v1362_v2 }
 0x71c   :  { %v1368_v5 = vsel %vm1367_vm10, %v1366_v60, -inf }
 0x71d   :  { %1369 = vmax.xlane.f32.xlu0 %v1368_v5 }
 0x7aa   :  { %v1370_v7 = vpop.xlane.xlu0 %1369 }
 0x7ab   :  { %v1371_v8 = vsub.f32 %v1366_v60, %v1370_v7 }
 0x7ad   :  { %v1372_v10 = vmul.f32 1.442695, %v1371_v8  ;;  %vm1379_vm11 = vcmp.eq.f32.partialorder %v1371_v8, 0.0 }
 0x7ae   :  { %v3408_v17 = vsel %vm1379_vm11, 1.0, %v4043_v1 }
 0x7af   :  { %3854 = vpow2.f32 %v1372_v10 }
 0x7b9   :  { %v3855_v55 = vpop.eup %3854 }
 0x7ba   :  { %v1374_v11 = vsel %vm1367_vm10, %v3855_v55, 0.0 }
 0x7bb   :  { %1375 = vadd.xlane.f32.xlu1 %v1374_v11 }
 0x848   :  { %v1376_v13 = vpop.xlane.xlu1 %1375 }
 0x849   :  { %3856 = vrcp.f32 %v1376_v13 }
 0x853   :  { %v3857_v15 = vpop.eup %3856 }
 0x854   :  { %v1378_v16 = vmul.f32 %v3857_v15, %v3855_v55 }
 0x856   :  { %v1382_v18 = vsub.f32 %v3408_v17, %v1378_v16 }
 0x858   :  { %v1383_v58 = vadd.f32 %v1382_v18, %v1378_v16 }
 0x85a   :  { %3612 = vmatmul.mubr.msk.f32.vlgmr.msra.gmra.mrb[10].mxu1 %vm975_vm9, %v1383_v58  ;;  %3344 = vst.msk [vmem:[#allocation10] sm:$0xf] %vm1367_vm10, %v1383_v58 }
 0x85b   :  { %3749 = vmatpush3.bf16.msra.mxu1 %v4272_v26  ;;  %3622 = vmatprep.mubr.msk.f32.mxu1 %vm4042_vm0, %v4043_v1 }
 0x85c   :  { %3750 = vmatprep.subr.bf16.mxu1 %v4041_v0 }
 0x85f   :  { %3752 = vmatpush3.bf16.msra.mxu1 %v4286_v31 }
 0x860   :  { %3637 = vmatprep.subr.mxu1 %v4043_v1 }
 0x862   :  { %3623 = vmatmul.mubr.msk.f32.vlgmr.msra.gmra.mrb[12].mxu1 %vm312_vm2, %v1291_v48 }
 0x863   :  { %3638 = vmatpush3.msra.mxu1 %v4438_v56  ;;  %3639 = vmatprep.mubr.msk.f32.mxu1 %vm4042_vm0, %v4043_v1 }
 0x864   :  { %3647 = vmatprep.subr.mxu1 %v4043_v1 }
 0x92d   :  { %v1453_v19 = vpop.f32.mrb[10].mxu1 }
 0x92e   :  { %v3613_v20 = vpop.f32.mrb[11].mxu1  ;;  %3630 = vmatmul.mubr.msk.f32.vlgmr.msra.gmra.mrb[10].mxu0 %vm226_vm1, %v1453_v19 }
 0x92f   :  { %3633 = vmatpush3.msra.mxu0 %v4438_v56  ;;  %3634 = vmatprep.mubr.msk.f32.mxu0 %vm4042_vm0, %v4043_v1 }
 0x930   :  { %3642 = vmatprep.subr.mxu0 %v4043_v1 }
 0x935   :  { %v1523_v21 = vpop.f32.mrb[12].mxu1 }
 0x936   :  { %v3624_v23 = vpop.f32.mrb[13].mxu1 }
 0xa01   :  { %v1596_v24 = vpop.f32.mrb[10].mxu0 }
 0xa02   :  { %v1597_v27 = vadd.f32 %v1596_v24, %v1523_v21  ;;  %v3631_v28 = vpop.f32.mrb[11].mxu0 }
 0xa04   :  { %v4552_v32 = vadd.f32 %v4304_v42, %v1597_v27 }
 0xa06   :  { %v1604_v33 = vand.u32 2139095040, %v4552_v32  ;;  %v1601_v44 = vand.u32 2147483647, %v4552_v32  ;;  %vm1603_vm11 = vcmp.lt.s32.totalorder %v4552_v32, 0 }
 0xa08   :  { %v1605_v37 = vshrl.u32 %v1604_v33, 23  ;;  %v1608_v48 = vand.u32 8388607, %v1601_v44 }
 0xa0a   :  { %v3412_v38 = vadd.s32 4294967169, %v1605_v37  ;;  %v1609_v13 = vor.u32 8388608, %v1608_v48 }
 0xa0c   :  { %v1611_v46 = vadd.s32 1, %v3412_v38  ;;  %v1649_v37 = vshll.u32 %v1609_v13, 8 }
 0xa0e   :  { %vm1612_vm12 = vcmp.gt.s32.totalorder %v1611_v46, 0 }
 0xa0f   :  { %v1613_v35 = vsel %vm1612_vm12, %v1611_v46, 0  ;;  %vm1602_vm12 = vcmp.le.f32.partialorder %v1601_v44, 0.7853982 }
 0xa10   :  { %v1615_v47 = vand.u32 31, %v1613_v35  ;;  %v1614_v54 = vshrl.u32 %v1613_v35, 5 }
 0xa12   :  { %v1616_v52 = vsub.s32 32, %v1615_v47  ;;  %v1618_v2 = vshll.u32 %v4044_v57, %v1615_v47  ;;  %v1621_v42 = vshll.u32 %v4045_v59, %v1615_v47  ;;  %v1624_v5 = vshll.u32 %v4046_v62, %v1615_v47 }
 0xa13   :  { %v1627_v8 = vshll.u32 %v4047_v3, %v1615_v47  ;;  %v1630_v55 = vshll.u32 %v4048_v6, %v1615_v47  ;;  %vm1633_vm13 = vcmp.lt.s32.totalorder %v1614_v54, 1  ;;  %vm1636_vm14 = vcmp.lt.s32.totalorder %v1614_v54, 4 }
 0xa14   :  { %v1619_v4 = vshrl.u32 %v4045_v59, %v1616_v52  ;;  %v1622_v60 = vshrl.u32 %v4046_v62, %v1616_v52  ;;  %v1625_v7 = vshrl.u32 %v4047_v3, %v1616_v52  ;;  %v1628_v10 = vshrl.u32 %v4048_v6, %v1616_v52 }
 0xa15   :  { %v1631_v11 = vshrl.u32 %v4049_v9, %v1616_v52  ;;  %v1617_v23 = vshrl.u32 %v4044_v57, %v1616_v52  ;;  %vm1635_vm15 = vcmp.lt.s32.totalorder %v1614_v54, 3  ;;  %vm1634_vm3 = vcmp.lt.s32.totalorder %v1614_v54, 2 }
 0xa16   :  { %v1620_v15 = vor.u32 %v1619_v4, %v1618_v2  ;;  %v1623_v16 = vor.u32 %v1622_v60, %v1621_v42  ;;  %v1626_v17 = vor.u32 %v1625_v7, %v1624_v5  ;;  %v1629_v18 = vor.u32 %v1628_v10, %v1627_v8 }
 0xa17   :  { %v1632_v58 = vor.u32 %v1631_v11, %v1630_v55 }
 0xa18   :  { %v1638_v19 = vsel %vm1636_vm14, %v1626_v17, 2102212464  ;;  %v1641_v20 = vsel %vm1633_vm13, %v1620_v15, %v1623_v16  ;;  %v1645_v21 = vsel %vm1633_vm13, %v1623_v16, %v1626_v17  ;;  %v1642_v24 = vsel %vm1636_vm14, %v1629_v18, 920167782 }
 0xa19   :  { %v1646_v27 = vsel %vm1636_vm14, %v1632_v58, 1326507024  ;;  %v1643_v28 = vsel %vm1635_vm15, %v1626_v17, %v1642_v24  ;;  %v1637_v38 = vsel %vm1633_vm13, %v1617_v23, %v1620_v15  ;;  %v1639_v46 = vsel %vm1635_vm15, %v1623_v16, %v1638_v19 }
 0xa1a   :  { %v1647_v33 = vsel %vm1635_vm15, %v1629_v18, %v1646_v27  ;;  %v1644_v35 = vsel %vm1634_vm3, %v1641_v20, %v1643_v28  ;;  %v1640_v60 = vsel %vm1634_vm3, %v1637_v38, %v1639_v46 }
 0xa1b   :  { %v1648_v47 = vsel %vm1634_vm3, %v1645_v21, %v1647_v33  ;;  %v4572_v42 = vmul.u32.u64.low %v1649_v37, %v1644_v35  ;;  %v4573_v4 = vmul.u32.u64.high %v1649_v37, %v1644_v35, %v4572_v42  ;;  %v1656_v5 = vmul.u32 %v1649_v37, %v1640_v60 }
 0xa1c   :  { %v4569_v48 = vmul.u32.u64.low %v1649_v37, %v1648_v47  ;;  %v4570_v2 = vmul.u32.u64.high %v1649_v37, %v1648_v47, %v4569_v48 }
 0xa1d   :  { %v1659_v52 = vadd.s32 1, %v4573_v4 }
 0xa1e   :  { %vm1658_vm4 = vc.u32 %v4570_v2, %v4572_v42  ;;  %v1657_v58 = vadd.s32 %v4572_v42, %v4570_v2 }
 0xa1f   :  { %v1660_v54 = vsel %vm1658_vm4, %v1659_v52, %v4573_v4 }
 0xa20   :  { %v1661_v7 = vadd.s32 %v1660_v54, %v1656_v5 }
 0xa22   :  { %v1662_v8 = vadd.s32 536870912, %v1661_v7 }
 0xa24   :  { %v1663_v10 = vshrl.u32 %v1662_v8, 30 }
 0xa26   :  { %v1664_v55 = vshll.u32 %v1663_v10, 30  ;;  %v1687_v35 = vsub.s32 4, %v1663_v10 }
 0xa28   :  { %v1665_v11 = vsub.s32 %v1661_v7, %v1664_v55  ;;  %v1688_v2 = vsel %vm1603_vm11, %v1687_v35, %v1663_v10 }
 0xa29   :  { %v1690_v4 = vsel %vm1602_vm12, 0, %v1688_v2 }
 0xa2a   :  { %v1667_v13 = vsub.s32 0, %v1665_v11  ;;  %v1797_v60 = vadd.s32 3, %v1690_v4  ;;  %v1694_v52 = vand.u32 3, %v1690_v4 }
 0xa2c   :  { %v3413_v15 = vmin.u32 %v1667_v13, %v1665_v11  ;;  %v1798_v5 = vand.u32 3, %v1797_v60  ;;  %vm1699_vm13 = vcmp.eq.s32.totalorder %v1694_v52, 2  ;;  %vm1696_vm15 = vcmp.eq.s32.totalorder %v1694_v52, 0 }
 0xa2d   :  { %vm1695_vm4 = vcmp.lt.s32.totalorder %v1694_v52, 2 }
 0xa2e   :  { %v1669_v16 = vclz %v3413_v15  ;;  %vm1803_vm14 = vcmp.eq.s32.totalorder %v1798_v5, 2  ;;  %vm1800_vm3 = vcmp.eq.s32.totalorder %v1798_v5, 0 }
 0xa30   :  { %v3414_v17 = vadd.s32 4294967294, %v1669_v16 }
 0xa32   :  { %vm3415_vm5 = vcmp.lt.s32.totalorder %v3414_v17, 0 }
 0xa33   :  { %v1672_v18 = vsel %vm3415_vm5, 0, %v3414_v17  ;;  %vm1799_vm5 = vcmp.lt.s32.totalorder %v1798_v5, 2 }
 0xa34   :  { %v1673_v19 = vsub.s32 32, %v1672_v18  ;;  %v1677_v20 = vsub.s32 4294967266, %v1672_v18  ;;  %v1674_v21 = vshll.u32 %v1665_v11, %v1672_v18 }
 0xa36   :  { %v1675_v23 = vshrl.u32 %v1657_v58, %v1673_v19  ;;  %v1678_v24 = vadd.s32 127, %v1677_v20 }
 0xa38   :  { %v1676_v27 = vor.u32 %v1675_v23, %v1674_v21  ;;  %v1679_v28 = vshll.u32 %v1678_v24, 23 }
 0xa3a   :  { %v1680_v33 = vor.u32 4788187, %v1679_v28  ;;  %v1683_v38 = vcvt.s32.f32 %v1676_v27 }
 0xa3c   :  { %v1681_v37 = vand.u32 2147483647, %v1680_v33 }
 0xa3e   :  { %v1684_v46 = vmul.f32 %v1683_v38, %v1681_v37 }
 0xa40   :  { %v1685_v47 = vxor.u32 2147483648, %v1684_v46 }
 0xa42   :  { %v1686_v48 = vsel %vm1603_vm11, %v1685_v47, %v1684_v46  ;;  %vm1693_vm11 = vweird.f32 %v4552_v32 }
 0xa43   :  { %v1689_v42 = vsel %vm1602_vm12, %v4552_v32, %v1686_v48 }
 0xa44   :  { %3858 = vcosq.f32 %v1689_v42 }
 0xa45   :  { %3860 = vsinq.f32 %v1689_v42 }
 0xa4e   :  { %v3859_v54 = vpop.eup %3858 }
 0xa4f   :  { %v3861_v7 = vpop.eup %3860  ;;  %v1700_v8 = vxor.u32 2147483648, %v3859_v54 }
 0xa50   :  { %v1697_v55 = vxor.u32 2147483648, %v3861_v7 }
 0xa51   :  { %v1701_v11 = vsel %vm1699_vm13, %v1700_v8, %v3861_v7  ;;  %v1805_v44 = vsel %vm1803_vm14, %v1700_v8, %v3861_v7 }
 0xa52   :  { %v1698_v10 = vsel %vm1696_vm15, %v3859_v54, %v1697_v55  ;;  %v1802_v13 = vsel %vm1800_vm3, %v3859_v54, %v1697_v55 }
 0xa53   :  { %v1702_v15 = vsel %vm1695_vm4, %v1698_v10, %v1701_v11  ;;  %v1806_v16 = vsel %vm1799_vm5, %v1802_v13, %v1805_v44 }
 0xa54   :  { %v1703_v17 = vsel %vm1693_vm11, nan, %v1702_v15  ;;  %v1807_v18 = vsel %vm1693_vm11, nan, %v1806_v16 }
 0xa55   :  { %v1845_v58 = vmul.f32 %v4377_v40, %v1703_v17  ;;  %v1846_v19 = vmul.f32 %v4382_v41, %v1807_v18  ;;  %v1808_v20 = vmul.f32 %v4356_v29, %v1703_v17  ;;  %v1809_v21 = vmul.f32 %v4361_v34, %v1807_v18 }
 0xa56   :  { %v1919_v23 = vmul.f32 %v4366_v36, %v1703_v17  ;;  %v1920_v24 = vmul.f32 %v4372_v39, %v1807_v18  ;;  %v1882_v27 = vmul.f32 %v4346_v51, %v1703_v17  ;;  %v1883_v32 = vmul.f32 %v4351_v25, %v1807_v18 }
 0xa57   :  { %v1847_v28 = vsub.f32 %v1845_v58, %v1846_v19  ;;  %v1810_v33 = vsub.f32 %v1808_v20, %v1809_v21 }
 0xa58   :  { %v4592_v37 = vsub.f32 %v1919_v23, %v1920_v24  ;;  %v1884_v38 = vsub.f32 %v1882_v27, %v1883_v32 }
 0xa59   :  { %v1848_v40 = vmul.f32 %v1847_v28, %v4385_v43  ;;  %v1811_v41 = vmul.f32 %v1810_v33, %v4385_v43 }
 0xa5a   :  { %v1922_v36 = vmul.f32 %v4592_v37, %v4385_v43  ;;  %v1885_v51 = vmul.f32 %v1884_v38, %v4385_v43 }
 0xa5b   :  { %v1849_v29 = vadd.f32 %v4341_v22, %v1848_v40  ;;  %v1812_v34 = vadd.f32 %v4341_v22, %v1811_v41 }
 0xa5c   :  { %v1923_v25 = vadd.f32 %v4341_v22, %v1922_v36  ;;  %v1886_v39 = vadd.f32 %v4341_v22, %v1885_v51 }
 0xa5d   :  { %1851 = vrot.lane.b32.xlu1 %v1849_v29, %s4050_s0  ;;  %1814 = vrot.lane.b32.xlu0 %v1812_v34, %s4050_s0 }
 0xa61   :  { %1925 = vrot.lane.b32.xlu1 %v1923_v25, %s4050_s0  ;;  %1888 = vrot.lane.b32.xlu0 %v1886_v39, %s4050_s0 }
 0xacf   :  { %v1852_v46 = vpop.permute.xlu1 %1851  ;;  %v1815_v35 = vpop.permute.xlu0 %1814 }
 0xad0   :  { %v1854_v47 = vsel %vm833_vm6, 1.0, %v1852_v46  ;;  %v1817_v48 = vsel %vm833_vm6, 1.0, %v1815_v35 }
 0xad1   :  { %v1855_v2 = vmul.f32 %v1854_v47, %v1849_v29  ;;  %v1818_v42 = vmul.f32 %v1817_v48, %v1812_v34 }
 0xad3   :  { %1857 = vrot.lane.b32.xlu1 %v1855_v2, %s4052_s9  ;;  %v1926_v4 = vpop.permute.xlu1 %1925  ;;  %1820 = vrot.lane.b32.xlu0 %v1818_v42, %s4052_s9  ;;  %v1889_v60 = vpop.permute.xlu0 %1888 }
 0xad4   :  { %v1928_v52 = vsel %vm833_vm6, 1.0, %v1926_v4  ;;  %v1891_v5 = vsel %vm833_vm6, 1.0, %v1889_v60 }
 0xad5   :  { %v1929_v54 = vmul.f32 %v1928_v52, %v1923_v25  ;;  %v1892_v7 = vmul.f32 %v1891_v5, %v1886_v39 }
 0xad7   :  { %1931 = vrot.lane.b32.xlu1 %v1929_v54, %s4052_s9  ;;  %1894 = vrot.lane.b32.xlu0 %v1892_v7, %s4052_s9 }
 0xb45   :  { %v1858_v8 = vpop.permute.xlu1 %1857  ;;  %v1821_v55 = vpop.permute.xlu0 %1820 }
 0xb46   :  { %v1860_v11 = vsel %vm840_vm7, 1.0, %v1858_v8  ;;  %v1823_v44 = vsel %vm840_vm7, 1.0, %v1821_v55 }
 0xb47   :  { %v1861_v10 = vmul.f32 %v1860_v11, %v1855_v2  ;;  %v1824_v13 = vmul.f32 %v1823_v44, %v1818_v42 }
 0xb49   :  { %1863 = vrot.lane.b32.xlu1 %v1861_v10, %s4053_s10  ;;  %v1932_v15 = vpop.permute.xlu1 %1931  ;;  %1826 = vrot.lane.b32.xlu0 %v1824_v13, %s4053_s10  ;;  %v1895_v16 = vpop.permute.xlu0 %1894 }
 0xb4a   :  { %v1934_v17 = vsel %vm840_vm7, 1.0, %v1932_v15  ;;  %v1897_v18 = vsel %vm840_vm7, 1.0, %v1895_v16 }
 0xb4b   :  { %v1935_v58 = vmul.f32 %v1934_v17, %v1929_v54  ;;  %v1898_v19 = vmul.f32 %v1897_v18, %v1892_v7 }
 0xb4d   :  { %1937 = vrot.lane.b32.xlu1 %v1935_v58, %s4053_s10  ;;  %1900 = vrot.lane.b32.xlu0 %v1898_v19, %s4053_s10 }
 0xb51   :  { %1876 = vperm.xlu1 %3816, %v1847_v28   ;;  %1839 = vperm.xlu0 %3815, %v1810_v33  }
 0xb55   :  { %3817 = vset.pattern.permute.xlu1 %v4054_v50  ;;  %3818 = vset.pattern.permute.xlu0 %v4054_v50 }
 0xbbb   :  { %v1864_v20 = vpop.permute.xlu1 %1863  ;;  %v1827_v21 = vpop.permute.xlu0 %1826 }
 0xbbc   :  { %v1866_v23 = vsel %vm847_vm8, 1.0, %v1864_v20  ;;  %v1829_v24 = vsel %vm847_vm8, 1.0, %v1827_v21 }
 0xbbd   :  { %v1867_v27 = vmul.f32 %v1866_v23, %v1861_v10  ;;  %v1830_v32 = vmul.f32 %v1829_v24, %v1824_v13 }
 0xbbf   :  { %1870 = vperm.xlu0 %3818, %v1867_v27   ;;  %1833 = vperm.xlu1 %3817, %v1830_v32   ;;  %v1901_v40 = vpop.permute.xlu0 %1900  ;;  %v1938_v28 = vpop.permute.xlu1 %1937 }
 0xbc0   :  { %v1903_v41 = vsel %vm847_vm8, 1.0, %v1901_v40  ;;  %v1940_v33 = vsel %vm847_vm8, 1.0, %v1938_v28 }
 0xbc1   :  { %v1904_v29 = vmul.f32 %v1903_v41, %v1898_v19  ;;  %v1941_v34 = vmul.f32 %v1940_v33, %v1935_v58 }
 0xbc3   :  { %3819 = vset.pattern.permute.xlu1 %v4051_v14  ;;  %1907 = vperm.xlu0 %3818, %v1904_v29  }
 0xbc4   :  { %1913 = vperm.xlu1 %3819, %v1884_v38  }
 0xbc7   :  { %3821 = vset.pattern.permute.xlu0 %v4051_v14 }
 0xbc8   :  { %1950 = vperm.xlu1 %3819, %v4592_v37  }
 0xbcc   :  { %3820 = vset.pattern.permute.xlu1 %v4054_v50 }
 0xbcd   :  { %1944 = vperm.xlu1 %3820, %v1941_v34  }
 0xbd0   :  { %v1877_v36 = vpop.permute.xlu1 %1876  ;;  %v1840_v51 = vpop.permute.xlu0 %1839 }
 0xbd1   :  { %3822 = vset.pattern.permute.xlu1 %v4051_v14  ;;  %v1879_v25 = vmul.f32 %v1877_v36, %v1867_v27  ;;  %v1842_v39 = vmul.f32 %v1840_v51, %v1830_v32 }
 0xbd3   :  { %v1880_v38 = vmul.f32 %v1879_v25, %v4385_v43  ;;  %v1843_v47 = vmul.f32 %v1842_v39, %v4385_v43 }
 0xc3e   :  { %v1834_v46 = vpop.permute.xlu1 %1833  ;;  %v1871_v35 = vpop.permute.xlu0 %1870 }
 0xc3f   :  { %v1836_v48 = vmul.f32 %v4341_v22, %v1834_v46  ;;  %v1873_v37 = vmul.f32 %v4341_v22, %v1871_v35 }
 0xc41   :  { %v1844_v2 = vadd.f32 %v1843_v47, %v1836_v48  ;;  %v1881_v42 = vadd.f32 %v1880_v38, %v1873_v37 }
 0xc42   :  { %v1908_v4 = vpop.permute.xlu0 %1907 }
 0xc43   :  { %v1914_v60 = vpop.permute.xlu1 %1913  ;;  %3635 = vmatmul.mubr.msk.f32.vlgmr.msra.gmra.mrb[12].mxu0 %vm975_vm9, %v1844_v2  ;;  %3640 = vmatmul.mubr.msk.f32.vlgmr.msra.gmra.mrb[14].mxu1 %vm975_vm9, %v1881_v42  ;;  %v1910_v5 = vmul.f32 %v4341_v22, %v1908_v4 }
 0xc44   :  { %v1916_v52 = vmul.f32 %v1914_v60, %v1904_v29  ;;  %3643 = vmatpush3.msra.mxu0 %v4438_v56  ;;  %3644 = vmatprep.mubr.msk.f32.mxu0 %vm4042_vm0, %v4043_v1 }
 0xc45   :  { %3648 = vmatpush3.msra.mxu1 %v4438_v56  ;;  %3649 = vmatprep.mubr.msk.f32.mxu1 %vm4042_vm0, %v4043_v1 }
 0xc46   :  { %v1917_v54 = vmul.f32 %v1916_v52, %v4385_v43  ;;  %3756 = vmatprep.subr.bf16.mxu0 %v4041_v0  ;;  %3663 = vmatprep.subr.mxu1 %v4043_v1 }
 0xc47   :  { %v1951_v7 = vpop.permute.xlu1 %1950 }
 0xc48   :  { %v1918_v8 = vadd.f32 %v1917_v54, %v1910_v5  ;;  %v1953_v55 = vmul.f32 %v1951_v7, %v1941_v34 }
 0xc4a   :  { %3645 = vmatmul.mubr.msk.f32.vlgmr.msra.gmra.mrb[14].mxu0 %vm975_vm9, %v1918_v8  ;;  %v1954_v44 = vmul.f32 %v1953_v55, %v4385_v43 }
 0xc4b   :  { %3758 = vmatpush3.bf16.msra.mxu0 %v4485_v53  ;;  %3660 = vmatprep.mubr.msk.f32.mxu0 %vm4042_vm0, %v4043_v1 }
 0xc4c   :  { %v1945_v11 = vpop.permute.xlu1 %1944  ;;  %3759 = vmatprep.subr.bf16.mxu0 %v4041_v0 }
 0xc4d   :  { %v1947_v10 = vmul.f32 %v4341_v22, %v1945_v11 }
 0xc4f   :  { %v1955_v13 = vadd.f32 %v1954_v44, %v1947_v10  ;;  %3761 = vmatpush3.bf16.msra.mxu0 %v4491_v61 }
 0xc50   :  { %3768 = vmatprep.subr.bf16.mxu0 %v4041_v0 }
 0xc51   :  { %3650 = vmatmul.mubr.msk.f32.vlgmr.msra.gmra.mrb[16].mxu1 %vm975_vm9, %v1955_v13 }
 0xc52   :  { %3664 = vmatpush3.msra.mxu1 %v4528_v12  ;;  %3665 = vmatprep.mubr.msk.f32.mxu1 %vm4042_vm0, %v4043_v1 }
 0xc53   :  { %3762 = vmatprep.subr.bf16.mxu1 %v4041_v0 }
 0xd16   :  { %v2025_v15 = vpop.f32.mrb[12].mxu0  ;;  %v2098_v16 = vpop.f32.mrb[14].mxu1 }
 0xd17   :  { %v2026_v17 = vadd.f32 %v4499_v63, %v2025_v15  ;;  %v2099_v22 = vadd.f32 %v4499_v63, %v2098_v16  ;;  %v3636_v18 = vpop.f32.mrb[13].mxu0  ;;  %v3641_v58 = vpop.f32.mrb[15].mxu1 }
 0xd18   :  { %v3906_v18 = vld [vmem:[%s4871_s11] ss:$0 sm:$0xff] }
 0xd19   :  { %v3424_v19 = vmul.f32 -1.442695, %v2026_v17  ;;  %v3425_v20 = vmul.f32 -1.442695, %v2099_v22 }
 0xd1b   :  { %3862 = vpow2.f32 %v3424_v19 }
 0xd1c   :  { %3864 = vpow2.f32 %v3425_v20 }
 0xd1d   :  { %v2171_v21 = vpop.f32.mrb[14].mxu0 }
 0xd1e   :  { %v3646_v23 = vpop.f32.mrb[15].mxu0  ;;  %v2172_v12 = vadd.f32 %v4499_v63, %v2171_v21 }
 0xd20   :  { %3866 = vtanh.f32 %v2172_v12 }
 0xd24   :  { %v2244_v24 = vpop.f32.mrb[16].mxu1 }
 0xd25   :  { %v3863_v27 = vpop.eup %3862  ;;  %v2245_v32 = vadd.f32 %v4499_v63, %v2244_v24  ;;  %v3651_v40 = vpop.f32.mrb[17].mxu1 }
 0xd26   :  { %v3865_v41 = vpop.eup %3864  ;;  %v2251_v29 = vadd.f32 1.0, %v3863_v27 }
 0xd27   :  { %v2257_v28 = vadd.f32 1.0, %v3865_v41  ;;  %v3426_v33 = vmul.f32 -1.442695, %v2245_v32 }
 0xd28   :  { %3868 = vrcp.f32 %v2251_v29 }
 0xd29   :  { %3870 = vrcp.f32 %v2257_v28 }
 0xd2a   :  { %3872 = vpow2.f32 %v3426_v33  ;;  %v3867_v34 = vpop.eup %3866 }
 0xd32   :  { %v3869_v36 = vpop.eup %3868 }
 0xd33   :  { %v3871_v51 = vpop.eup %3870  ;;  %v2268_v25 = vmul.f32 %v3869_v36, %v3867_v34 }
 0xd34   :  { %v3873_v39 = vpop.eup %3872  ;;  %v2267_v46 = vmul.f32 %v3871_v51, %v4506_v45  ;;  %v3428_v45 = vld [vmem:[%s4894_s4 + $0x4] sm:$0xf] }
 0xd35   :  { %v2264_v35 = vadd.f32 1.0, %v3873_v39 }
 0xd36   :  { %v4669_v38 = vadd.f32 %v2268_v25, %v2267_v46 }
 0xd37   :  { %3874 = vrcp.f32 %v2264_v35 }
 0xd38   :  { %3876 = vtanh.f32 %v4669_v38 }
 0xd41   :  { %v3875_v63 = vpop.eup %3874 }
 0xd42   :  { %v3877_v47 = vpop.eup %3876 }
 0xd43   :  { %v2271_v48 = vmul.f32 %v3877_v47, %v3875_v63 }
 0xd45   :  { %3661 = vmatmul.mubr.msk.f32.vlgmr.msra.gmra.mrb[16].mxu0 %vm312_vm2, %v2271_v48 }
 0xd46   :  { %3770 = vmatpush3.bf16.msra.mxu0 %v4283_v30  ;;  %3683 = vmatprep.mubr.msk.f32.mxu0 %vm4042_vm0, %v4043_v1 }
 0xd47   :  { %3686 = vmatprep.subr.mxu0 %v4043_v1 }
 0xe18   :  { %v2341_v37 = vpop.f32.mrb[16].mxu0 }
 0xe19   :  { %v2342_v2 = vadd.f32 %v4517_v49, %v2341_v37  ;;  %v3662_v42 = vpop.f32.mrb[17].mxu0 }
 0xe1b   :  { %v2347_v4 = vadd.f32 %v3428_v45, %v2342_v2 }
 0xe1d   :  { %v2348_v60 = vsel %vm1367_vm10, %v2347_v4, -inf }
 0xe1e   :  { %2349 = vmax.xlane.f32.xlu0 %v2348_v60 }
 0xeab   :  { %v2350_v52 = vpop.xlane.xlu0 %2349 }
 0xeac   :  { %v2351_v5 = vsub.f32 %v2347_v4, %v2350_v52 }
 0xeae   :  { %v2352_v30 = vmul.f32 1.442695, %v2351_v5  ;;  %vm2359_vm12 = vcmp.eq.f32.partialorder %v2351_v5, 0.0 }
 0xeaf   :  { %v3429_v49 = vsel %vm2359_vm12, 1.0, %v4043_v1 }
 0xeb0   :  { %3878 = vpow2.f32 %v2352_v30 }
 0xeba   :  { %v3879_v54 = vpop.eup %3878 }
 0xebb   :  { %v2354_v7 = vsel %vm1367_vm10, %v3879_v54, 0.0 }
 0xebc   :  { %2355 = vadd.xlane.f32.xlu1 %v2354_v7 }
 0xf49   :  { %v2356_v8 = vpop.xlane.xlu1 %2355 }
 0xf4a   :  { %3880 = vrcp.f32 %v2356_v8 }
 0xf54   :  { %v3881_v55 = vpop.eup %3880 }
 0xf55   :  { %v2358_v11 = vmul.f32 %v3881_v55, %v3879_v54 }
 0xf57   :  { %v2362_v44 = vsub.f32 %v3429_v49, %v2358_v11 }
 0xf59   :  { %v2363_v10 = vadd.f32 %v2362_v44, %v2358_v11 }
 0xf5b   :  { %3666 = vmatmul.mubr.msk.f32.vlgmr.msra.gmra.mrb[18].mxu1 %vm975_vm9, %v2363_v10  ;;  %3345 = vst.msk [vmem:[#allocation10 + $0x4] sm:$0xf] %vm1367_vm10, %v2363_v10 }
 0xf5c   :  { %3764 = vmatpush3.bf16.msra.mxu1 %v4272_v26  ;;  %3676 = vmatprep.mubr.msk.f32.mxu1 %vm4042_vm0, %v4043_v1 }
 0xf5d   :  { %3765 = vmatprep.subr.bf16.mxu1 %v4041_v0 }
 0xf60   :  { %3767 = vmatpush3.bf16.msra.mxu1 %v4286_v31 }
 0xf61   :  { %3691 = vmatprep.subr.mxu1 %v4043_v1 }
 0xf63   :  { %3677 = vmatmul.mubr.msk.f32.vlgmr.msra.gmra.mrb[20].mxu1 %vm312_vm2, %v2271_v48 }
 0xf64   :  { %3692 = vmatpush3.msra.mxu1 %v4438_v56  ;;  %3693 = vmatprep.mubr.msk.f32.mxu1 %vm4042_vm0, %v4043_v1 }
 0xf65   :  { %3701 = vmatprep.subr.mxu1 %v4043_v1 }
0x102e   :  { %v2433_v13 = vpop.f32.mrb[18].mxu1 }
0x102f   :  { %v3667_v26 = vpop.f32.mrb[19].mxu1  ;;  %3684 = vmatmul.mubr.msk.f32.vlgmr.msra.gmra.mrb[18].mxu0 %vm226_vm1, %v2433_v13 }
0x1030   :  { %3687 = vmatpush3.msra.mxu0 %v4438_v56  ;;  %3688 = vmatprep.mubr.msk.f32.mxu0 %vm4042_vm0, %v4043_v1 }
0x1031   :  { %3696 = vmatprep.subr.mxu0 %v4043_v1 }
0x1036   :  { %v2503_v31 = vpop.f32.mrb[20].mxu1 }
0x1037   :  { %v3678_v15 = vpop.f32.mrb[21].mxu1 }
0x1102   :  { %v2576_v16 = vpop.f32.mrb[18].mxu0 }
0x1103   :  { %v2577_v17 = vadd.f32 %v2576_v16, %v2503_v31  ;;  %v3685_v22 = vpop.f32.mrb[19].mxu0 }
0x1105   :  { %v4705_v58 = vadd.f32 %v3906_v18, %v2577_v17 }
0x1107   :  { %v2584_v19 = vand.u32 2139095040, %v4705_v58  ;;  %v2581_v23 = vand.u32 2147483647, %v4705_v58  ;;  %vm2583_vm11 = vcmp.lt.s32.totalorder %v4705_v58, 0 }
0x1109   :  { %v2585_v20 = vshrl.u32 %v2584_v19, 23  ;;  %v2588_v27 = vand.u32 8388607, %v2581_v23  ;;  %vm2582_vm12 = vcmp.le.f32.partialorder %v2581_v23, 0.7853982 }
0x110b   :  { %v3433_v56 = vadd.s32 4294967169, %v2585_v20  ;;  %v2589_v35 = vor.u32 8388608, %v2588_v27 }
0x110d   :  { %v2591_v21 = vadd.s32 1, %v3433_v56 }
0x110f   :  { %vm2592_vm1 = vcmp.gt.s32.totalorder %v2591_v21, 0 }
0x1110   :  { %v2593_v12 = vsel %vm2592_vm1, %v2591_v21, 0 }
0x1111   :  { %v2595_v24 = vand.u32 31, %v2593_v12  ;;  %v2594_v40 = vshrl.u32 %v2593_v12, 5 }
0x1113   :  { %v2596_v32 = vsub.s32 32, %v2595_v24  ;;  %v2598_v41 = vshll.u32 %v4044_v57, %v2595_v24  ;;  %v2601_v29 = vshll.u32 %v4045_v59, %v2595_v24  ;;  %v2604_v34 = vshll.u32 %v4046_v62, %v2595_v24 }
0x1114   :  { %v2607_v51 = vshll.u32 %v4047_v3, %v2595_v24  ;;  %v2610_v39 = vshll.u32 %v4048_v6, %v2595_v24  ;;  %vm2613_vm13 = vcmp.lt.s32.totalorder %v2594_v40, 1  ;;  %vm2616_vm14 = vcmp.lt.s32.totalorder %v2594_v40, 4 }
0x1115   :  { %v2599_v28 = vshrl.u32 %v4045_v59, %v2596_v32  ;;  %v2602_v33 = vshrl.u32 %v4046_v62, %v2596_v32  ;;  %v2605_v36 = vshrl.u32 %v4047_v3, %v2596_v32  ;;  %v2608_v25 = vshrl.u32 %v4048_v6, %v2596_v32 }
0x1116   :  { %v2611_v46 = vshrl.u32 %v4049_v9, %v2596_v32  ;;  %v2597_v42 = vshrl.u32 %v4044_v57, %v2596_v32  ;;  %vm2615_vm15 = vcmp.lt.s32.totalorder %v2594_v40, 3  ;;  %vm2614_vm3 = vcmp.lt.s32.totalorder %v2594_v40, 2 }
0x1117   :  { %v2600_v63 = vor.u32 %v2599_v28, %v2598_v41  ;;  %v2603_v47 = vor.u32 %v2602_v33, %v2601_v29  ;;  %v2606_v48 = vor.u32 %v2605_v36, %v2604_v34  ;;  %v2609_v37 = vor.u32 %v2608_v25, %v2607_v51 }
0x1118   :  { %v2612_v59 = vor.u32 %v2611_v46, %v2610_v39  ;;  %v2629_v9 = vshll.u32 %v2589_v35, 8 }
0x1119   :  { %v2618_v45 = vsel %vm2616_vm14, %v2606_v48, 2102212464  ;;  %v2621_v62 = vsel %vm2613_vm13, %v2600_v63, %v2603_v47  ;;  %v2625_v2 = vsel %vm2613_vm13, %v2603_v47, %v2606_v48  ;;  %v2622_v3 = vsel %vm2616_vm14, %v2609_v37, 920167782 }
0x111a   :  { %v2626_v4 = vsel %vm2616_vm14, %v2612_v59, 1326507024  ;;  %v2623_v6 = vsel %vm2615_vm15, %v2606_v48, %v2622_v3  ;;  %v2617_v52 = vsel %vm2613_vm13, %v2597_v42, %v2600_v63  ;;  %v2619_v5 = vsel %vm2615_vm15, %v2603_v47, %v2618_v45 }
0x111b   :  { %v2627_v60 = vsel %vm2615_vm15, %v2609_v37, %v2626_v4  ;;  %v2624_v30 = vsel %vm2614_vm3, %v2621_v62, %v2623_v6  ;;  %v2620_v49 = vsel %vm2614_vm3, %v2617_v52, %v2619_v5  ;;  %v3907_v52 = vld [vmem:[%s4872_s12 + $0x1] ss:$0 sm:$0xff] }
0x111c   :  { %v2628_v54 = vsel %vm2614_vm3, %v2625_v2, %v2627_v60  ;;  %v4725_v55 = vmul.u32.u64.low %v2629_v9, %v2624_v30  ;;  %v4726_v11 = vmul.u32.u64.high %v2629_v9, %v2624_v30, %v4725_v55  ;;  %v2636_v44 = vmul.u32 %v2629_v9, %v2620_v49  ;;  %v3908_v30 = vld [vmem:[%s4873_s13 + $0x1] ss:$0 sm:$0xff] }
0x111d   :  { %v4722_v7 = vmul.u32.u64.low %v2629_v9, %v2628_v54  ;;  %v4723_v8 = vmul.u32.u64.high %v2629_v9, %v2628_v54, %v4722_v7 }
0x111e   :  { %v2639_v57 = vadd.s32 1, %v4726_v11  ;;  %v3909_v7 = vld [vmem:[%s4872_s12] ss:$0 sm:$0xff] }
0x111f   :  { %vm2638_vm4 = vc.u32 %v4723_v8, %v4725_v55  ;;  %v2637_v56 = vadd.s32 %v4725_v55, %v4723_v8 }
0x1120   :  { %v2640_v10 = vsel %vm2638_vm4, %v2639_v57, %v4726_v11  ;;  %v3911_v11 = vld [vmem:[%s4872_s12 + $0x3] ss:$0 sm:$0xff] }
0x1121   :  { %v2641_v13 = vadd.s32 %v2640_v10, %v2636_v44  ;;  %v3912_v57 = vld [vmem:[%s4873_s13 + $0x3] ss:$0 sm:$0xff]  ;;  %v3913_v10 = vld [vmem:[%s4872_s12 + $0x2] ss:$0 sm:$0xff] }
0x1123   :  { %v2642_v26 = vadd.s32 536870912, %v2641_v13 }
0x1125   :  { %v2643_v31 = vshrl.u32 %v2642_v26, 30  ;;  %v3914_v26 = vld [vmem:[%s4873_s13 + $0x2] ss:$0 sm:$0xff] }
0x1127   :  { %v2644_v15 = vshll.u32 %v2643_v31, 30  ;;  %v2667_v36 = vsub.s32 4, %v2643_v31 }
0x1129   :  { %v2645_v16 = vsub.s32 %v2641_v13, %v2644_v15  ;;  %v2668_v39 = vsel %vm2583_vm11, %v2667_v36, %v2643_v31 }
0x112a   :  { %v2670_v35 = vsel %vm2582_vm12, 0, %v2668_v39 }
0x112b   :  { %v2647_v17 = vsub.s32 0, %v2645_v16  ;;  %v2777_v63 = vadd.s32 3, %v2670_v35  ;;  %v2674_v47 = vand.u32 3, %v2670_v35 }
0x112d   :  { %v3434_v22 = vmin.u32 %v2647_v17, %v2645_v16  ;;  %v2778_v48 = vand.u32 3, %v2777_v63  ;;  %vm2679_vm1 = vcmp.eq.s32.totalorder %v2674_v47, 2  ;;  %vm2676_vm14 = vcmp.eq.s32.totalorder %v2674_v47, 0 }
0x112e   :  { %vm2675_vm3 = vcmp.lt.s32.totalorder %v2674_v47, 2 }
0x112f   :  { %v2649_v18 = vclz %v3434_v22  ;;  %vm2783_vm13 = vcmp.eq.s32.totalorder %v2778_v48, 2  ;;  %vm2780_vm15 = vcmp.eq.s32.totalorder %v2778_v48, 0  ;;  %vm2779_vm4 = vcmp.lt.s32.totalorder %v2778_v48, 2 }
0x1131   :  { %v3435_v19 = vadd.s32 4294967294, %v2649_v18 }
0x1133   :  { %vm3436_vm5 = vcmp.lt.s32.totalorder %v3435_v19, 0 }
0x1134   :  { %v2652_v20 = vsel %vm3436_vm5, 0, %v3435_v19  ;;  %vm2673_vm5 = vweird.f32 %v4705_v58 }
0x1135   :  { %v2653_v21 = vsub.s32 32, %v2652_v20  ;;  %v2657_v12 = vsub.s32 4294967266, %v2652_v20  ;;  %v2654_v24 = vshll.u32 %v2645_v16, %v2652_v20  ;;  %v4768_v20 = vld [vmem:[%s4874_s14] ss:$0 sm:$0xff] }
0x1137   :  { %v2655_v27 = vshrl.u32 %v2637_v56, %v2653_v21  ;;  %v2658_v32 = vadd.s32 127, %v2657_v12 }
0x1139   :  { %v2656_v40 = vor.u32 %v2655_v27, %v2654_v24  ;;  %v2659_v41 = vshll.u32 %v2658_v32, 23 }
0x113b   :  { %v2660_v29 = vor.u32 4788187, %v2659_v41  ;;  %v2663_v33 = vcvt.s32.f32 %v2656_v40 }
0x113d   :  { %v2661_v28 = vand.u32 2147483647, %v2660_v29 }
0x113f   :  { %v2664_v34 = vmul.f32 %v2663_v33, %v2661_v28 }
0x1141   :  { %v2665_v51 = vxor.u32 2147483648, %v2664_v34 }
0x1143   :  { %v2666_v25 = vsel %vm2583_vm11, %v2665_v51, %v2664_v34 }
0x1144   :  { %v2669_v46 = vsel %vm2582_vm12, %v4705_v58, %v2666_v25  ;;  %v3910_v58 = vld [vmem:[%s4873_s13] ss:$0 sm:$0xff] }
0x1145   :  { %3882 = vcosq.f32 %v2669_v46 }
0x1146   :  { %3884 = vsinq.f32 %v2669_v46 }
0x114f   :  { %v3883_v37 = vpop.eup %3882 }
0x1150   :  { %v3885_v59 = vpop.eup %3884  ;;  %v2680_v45 = vxor.u32 2147483648, %v3883_v37 }
0x1151   :  { %v2677_v62 = vxor.u32 2147483648, %v3885_v59 }
0x1152   :  { %v2681_v2 = vsel %vm2679_vm1, %v2680_v45, %v3885_v59  ;;  %v2785_v23 = vsel %vm2783_vm13, %v2680_v45, %v3885_v59 }
0x1153   :  { %v2678_v42 = vsel %vm2676_vm14, %v3883_v37, %v2677_v62  ;;  %v2782_v3 = vsel %vm2780_vm15, %v3883_v37, %v2677_v62 }
0x1154   :  { %v2682_v4 = vsel %vm2675_vm3, %v2678_v42, %v2681_v2  ;;  %v2786_v6 = vsel %vm2779_vm4, %v2782_v3, %v2785_v23 }
0x1155   :  { %v2683_v60 = vsel %vm2673_vm5, nan, %v2682_v4  ;;  %v2787_v9 = vsel %vm2673_vm5, nan, %v2786_v6 }
0x1156   :  { %v2825_v5 = vmul.f32 %v3907_v52, %v2683_v60  ;;  %v2826_v54 = vmul.f32 %v3908_v30, %v2787_v9  ;;  %v2788_v8 = vmul.f32 %v3909_v7, %v2683_v60  ;;  %v2789_v55 = vmul.f32 %v3910_v58, %v2787_v9 }
0x1157   :  { %v2899_v49 = vmul.f32 %v3911_v11, %v2683_v60  ;;  %v2900_v44 = vmul.f32 %v3912_v57, %v2787_v9  ;;  %v2862_v13 = vmul.f32 %v3913_v10, %v2683_v60  ;;  %v2863_v31 = vmul.f32 %v3914_v26, %v2787_v9 }
0x1158   :  { %v2827_v15 = vsub.f32 %v2825_v5, %v2826_v54  ;;  %v2790_v16 = vsub.f32 %v2788_v8, %v2789_v55 }
0x1159   :  { %v4761_v17 = vsub.f32 %v2899_v49, %v2900_v44  ;;  %v2864_v22 = vsub.f32 %v2862_v13, %v2863_v31 }
0x115a   :  { %v2828_v18 = vmul.f32 %v2827_v15, %v4385_v43  ;;  %v2791_v19 = vmul.f32 %v2790_v16, %v4385_v43 }
0x115b   :  { %v2902_v12 = vmul.f32 %v4761_v17, %v4385_v43  ;;  %v2865_v24 = vmul.f32 %v2864_v22, %v4385_v43 }
0x115c   :  { %v2829_v56 = vadd.f32 %v4768_v20, %v2828_v18  ;;  %v2792_v21 = vadd.f32 %v4768_v20, %v2791_v19 }
0x115d   :  { %v2903_v27 = vadd.f32 %v4768_v20, %v2902_v12  ;;  %v2866_v32 = vadd.f32 %v4768_v20, %v2865_v24 }
0x115e   :  { %2831 = vrot.lane.b32.xlu1 %v2829_v56, %s4050_s0  ;;  %2794 = vrot.lane.b32.xlu0 %v2792_v21, %s4050_s0 }
0x1162   :  { %2905 = vrot.lane.b32.xlu1 %v2903_v27, %s4050_s0  ;;  %2868 = vrot.lane.b32.xlu0 %v2866_v32, %s4050_s0 }
0x11d0   :  { %v2832_v40 = vpop.permute.xlu1 %2831  ;;  %v2795_v41 = vpop.permute.xlu0 %2794 }
0x11d1   :  { %v2834_v29 = vsel %vm833_vm6, 1.0, %v2832_v40  ;;  %v2797_v28 = vsel %vm833_vm6, 1.0, %v2795_v41 }
0x11d2   :  { %v2835_v33 = vmul.f32 %v2834_v29, %v2829_v56  ;;  %v2798_v34 = vmul.f32 %v2797_v28, %v2792_v21  ;;  %v3916_v56 = vld [vmem:[%s4875_s15] sm:$0xff] }
0x11d4   :  { %2837 = vrot.lane.b32.xlu1 %v2835_v33, %s4052_s9  ;;  %v2906_v36 = vpop.permute.xlu1 %2905  ;;  %2800 = vrot.lane.b32.xlu0 %v2798_v34, %s4052_s9  ;;  %v2869_v51 = vpop.permute.xlu0 %2868 }
0x11d5   :  { %v2908_v25 = vsel %vm833_vm6, 1.0, %v2906_v36  ;;  %v2871_v39 = vsel %vm833_vm6, 1.0, %v2869_v51 }
0x11d6   :  { %v2909_v46 = vmul.f32 %v2908_v25, %v2903_v27  ;;  %v2872_v35 = vmul.f32 %v2871_v39, %v2866_v32 }
0x11d8   :  { %2911 = vrot.lane.b32.xlu1 %v2909_v46, %s4052_s9  ;;  %2874 = vrot.lane.b32.xlu0 %v2872_v35, %s4052_s9 }
0x1246   :  { %v2838_v63 = vpop.permute.xlu1 %2837  ;;  %v2801_v47 = vpop.permute.xlu0 %2800 }
0x1247   :  { %v2840_v48 = vsel %vm840_vm7, 1.0, %v2838_v63  ;;  %v2803_v37 = vsel %vm840_vm7, 1.0, %v2801_v47 }
0x1248   :  { %v2841_v59 = vmul.f32 %v2840_v48, %v2835_v33  ;;  %v2804_v45 = vmul.f32 %v2803_v37, %v2798_v34 }
0x124a   :  { %2843 = vrot.lane.b32.xlu1 %v2841_v59, %s4053_s10  ;;  %v2912_v62 = vpop.permute.xlu1 %2911  ;;  %2806 = vrot.lane.b32.xlu0 %v2804_v45, %s4053_s10  ;;  %v2875_v2 = vpop.permute.xlu0 %2874 }
0x124b   :  { %v2914_v23 = vsel %vm840_vm7, 1.0, %v2912_v62  ;;  %v2877_v42 = vsel %vm840_vm7, 1.0, %v2875_v2 }
0x124c   :  { %v2915_v3 = vmul.f32 %v2914_v23, %v2909_v46  ;;  %v2878_v4 = vmul.f32 %v2877_v42, %v2872_v35 }
0x124e   :  { %2917 = vrot.lane.b32.xlu1 %v2915_v3, %s4053_s10  ;;  %2880 = vrot.lane.b32.xlu0 %v2878_v4, %s4053_s10 }
0x1252   :  { %2856 = vperm.xlu1 %3822, %v2827_v15   ;;  %2819 = vperm.xlu0 %3821, %v2790_v16  }
0x1256   :  { %3823 = vset.pattern.permute.xlu1 %v4054_v50  ;;  %3824 = vset.pattern.permute.xlu0 %v4054_v50 }
0x12bc   :  { %v2844_v6 = vpop.permute.xlu1 %2843  ;;  %v2807_v60 = vpop.permute.xlu0 %2806 }
0x12bd   :  { %v2846_v9 = vsel %vm847_vm8, 1.0, %v2844_v6  ;;  %v2809_v52 = vsel %vm847_vm8, 1.0, %v2807_v60 }
0x12be   :  { %v2847_v5 = vmul.f32 %v2846_v9, %v2841_v59  ;;  %v2810_v30 = vmul.f32 %v2809_v52, %v2804_v45 }
0x12c0   :  { %2850 = vperm.xlu0 %3824, %v2847_v5   ;;  %2813 = vperm.xlu1 %3823, %v2810_v30   ;;  %v2881_v54 = vpop.permute.xlu0 %2880  ;;  %v2918_v58 = vpop.permute.xlu1 %2917 }
0x12c1   :  { %v2883_v7 = vsel %vm847_vm8, 1.0, %v2881_v54  ;;  %v2920_v55 = vsel %vm847_vm8, 1.0, %v2918_v58 }
0x12c2   :  { %v2884_v8 = vmul.f32 %v2883_v7, %v2878_v4  ;;  %v2921_v11 = vmul.f32 %v2920_v55, %v2915_v3  ;;  %v3449_v7 = vld [vmem:[%s4894_s4 + $0x8] sm:$0xf] }
0x12c4   :  { %3825 = vset.pattern.permute.xlu1 %v4051_v14  ;;  %2887 = vperm.xlu0 %3824, %v2884_v8  }
0x12c5   :  { %2893 = vperm.xlu1 %3825, %v2864_v22  }
0x12c8   :  { %3827 = vset.pattern.permute.xlu0 %v4051_v14 }
0x12c9   :  { %2930 = vperm.xlu1 %3825, %v4761_v17  }
0x12cd   :  { %3826 = vset.pattern.permute.xlu1 %v4054_v50 }
0x12ce   :  { %2924 = vperm.xlu1 %3826, %v2921_v11  }
0x12d1   :  { %v2857_v49 = vpop.permute.xlu1 %2856  ;;  %v2820_v57 = vpop.permute.xlu0 %2819 }
0x12d2   :  { %v2859_v44 = vmul.f32 %v2857_v49, %v2847_v5  ;;  %v2822_v10 = vmul.f32 %v2820_v57, %v2810_v30 }
0x12d4   :  { %v2860_v31 = vmul.f32 %v2859_v44, %v4385_v43  ;;  %v2823_v15 = vmul.f32 %v2822_v10, %v4385_v43 }
0x133f   :  { %v2814_v13 = vpop.permute.xlu1 %2813  ;;  %v2851_v26 = vpop.permute.xlu0 %2850 }
0x1340   :  { %v2816_v14 = vmul.f32 %v4768_v20, %v2814_v13  ;;  %v2853_v16 = vmul.f32 %v4768_v20, %v2851_v26 }
0x1342   :  { %v2824_v22 = vadd.f32 %v2823_v15, %v2816_v14  ;;  %v2861_v17 = vadd.f32 %v2860_v31, %v2853_v16 }
0x1343   :  { %v2888_v18 = vpop.permute.xlu0 %2887 }
0x1344   :  { %v2894_v19 = vpop.permute.xlu1 %2893  ;;  %3689 = vmatmul.mubr.msk.f32.vlgmr.msra.gmra.mrb[20].mxu0 %vm975_vm9, %v2824_v22  ;;  %3694 = vmatmul.mubr.msk.f32.vlgmr.msra.gmra.mrb[22].mxu1 %vm975_vm9, %v2861_v17  ;;  %v2890_v21 = vmul.f32 %v4768_v20, %v2888_v18 }
0x1345   :  { %v2896_v50 = vmul.f32 %v2894_v19, %v2884_v8  ;;  %3697 = vmatpush3.msra.mxu0 %v3916_v56  ;;  %3698 = vmatprep.mubr.msk.f32.mxu0 %vm4042_vm0, %v4043_v1  ;;  %v3918_v8 = vld [vmem:[%s4878_s18] ss:$0 sm:$0xff]  ;;  %s4055_s18 = smov [#allocation10]  }
0x1346   :  { %3702 = vmatpush3.msra.mxu1 %v3916_v56  ;;  %3703 = vmatprep.mubr.msk.f32.mxu1 %vm4042_vm0, %v4043_v1  ;;  %s3352_s4 = sshll.u32 %s4055_s18, 4  ;;  %s3353_s4 = int_to_ptr.vmem [resolvable:$true] %s3352_s4 }
0x1347   :  { %v2897_v12 = vmul.f32 %v2896_v50, %v4385_v43  ;;  %3771 = vmatprep.subr.bf16.mxu0 %v4041_v0  ;;  %s4007_s24 = scalar_lea.vmem %s3353_s4, 192  ;;  %p4012_p5 = scmp.lt.s32.totalorder %s3353_s4, %s3353_s4 }
0x1348   :  { %v2931_v24 = vpop.permute.xlu1 %2930  ;;  %p4008_p4 = scmp.ne.s32.totalorder %s3353_s4, %s4007_s24  ;;  %p4013_p6 = scmp.lt.s32.totalorder %s4007_s24, %s4007_s24 }
0x1349   :  { %v2898_v27 = vadd.f32 %v2897_v12, %v2890_v21  ;;  %v2933_v32 = vmul.f32 %v2931_v24, %v2921_v11 }
0x134a   :  { %p4014_p7 = por %p4013_p6, %p4012_p5 }
0x134b   :  { %3699 = vmatmul.mubr.msk.f32.vlgmr.msra.gmra.mrb[22].mxu0 %vm975_vm9, %v2898_v27  ;;  %v2934_v41 = vmul.f32 %v2933_v32, %v4385_v43 }
0x134c   :  { %3773 = vmatpush3.bf16.msra.mxu0 %v4485_v53  ;;  %3714 = vmatprep.mubr.msk.f32.mxu0 %vm4042_vm0, %v4043_v1  ;;  %v3917_v53 = vld [vmem:[%s4876_s16] ss:$0 sm:$0xff]  ;;  %p4015_p8 = pnand %p4014_p7, %p4008_p4 }
0x134d   :  { %v2925_v40 = vpop.permute.xlu1 %2924  ;;  %3774 = vmatprep.subr.bf16.mxu0 %v4041_v0 }
0x134e   :  { %v2927_v29 = vmul.f32 %v4768_v20, %v2925_v40 }
0x1350   :  { %v2935_v28 = vadd.f32 %v2934_v41, %v2927_v29  ;;  %3776 = vmatpush3.bf16.msra.mxu0 %v4491_v61 }
0x1352   :  { %3704 = vmatmul.mubr.msk.f32.vlgmr.msra.gmra.mrb[24].mxu1 %vm975_vm9, %v2935_v28 }
0x1417   :  { %v3005_v33 = vpop.f32.mrb[20].mxu0  ;;  %v3078_v34 = vpop.f32.mrb[22].mxu1 }
0x1418   :  { %v3006_v36 = vadd.f32 %v3917_v53, %v3005_v33  ;;  %v3079_v51 = vadd.f32 %v3917_v53, %v3078_v34  ;;  %v3690_v25 = vpop.f32.mrb[21].mxu0  ;;  %v3695_v39 = vpop.f32.mrb[23].mxu1 }
0x141a   :  { %v3445_v0 = vmul.f32 -1.442695, %v3006_v36  ;;  %v3446_v46 = vmul.f32 -1.442695, %v3079_v51 }
0x141c   :  { %3886 = vpow2.f32 %v3445_v0 }
0x141d   :  { %3888 = vpow2.f32 %v3446_v46 }
0x141e   :  { %v3151_v43 = vpop.f32.mrb[22].mxu0 }
0x141f   :  { %v3700_v20 = vpop.f32.mrb[23].mxu0  ;;  %v3152_v35 = vadd.f32 %v3917_v53, %v3151_v43 }
0x1421   :  { %3890 = vtanh.f32 %v3152_v35 }
0x1425   :  { %v3224_v61 = vpop.f32.mrb[24].mxu1 }
0x1426   :  { %v3887_v63 = vpop.eup %3886  ;;  %v3225_v47 = vadd.f32 %v3917_v53, %v3224_v61  ;;  %v3705_v48 = vpop.f32.mrb[25].mxu1 }
0x1427   :  { %v3889_v37 = vpop.eup %3888  ;;  %v3231_v59 = vadd.f32 1.0, %v3887_v63 }
0x1428   :  { %v3237_v45 = vadd.f32 1.0, %v3889_v37  ;;  %v3447_v62 = vmul.f32 -1.442695, %v3225_v47 }
0x1429   :  { %3892 = vrcp.f32 %v3231_v59 }
0x142a   :  { %3894 = vrcp.f32 %v3237_v45 }
0x142b   :  { %3896 = vpow2.f32 %v3447_v62  ;;  %v3891_v2 = vpop.eup %3890 }
0x1433   :  { %v3893_v23 = vpop.eup %3892 }
0x1434   :  { %v3895_v42 = vpop.eup %3894  ;;  %v3248_v3 = vmul.f32 %v3893_v23, %v3891_v2 }
0x1435   :  { %v3897_v4 = vpop.eup %3896  ;;  %v3247_v6 = vmul.f32 %v3895_v42, %v4669_v38 }
0x1436   :  { %v3244_v60 = vadd.f32 1.0, %v3897_v4 }
0x1437   :  { %v3249_v9 = vadd.f32 %v3248_v3, %v3247_v6 }
0x1438   :  { %3898 = vrcp.f32 %v3244_v60 }
0x1439   :  { %3900 = vtanh.f32 %v3249_v9 }
0x1442   :  { %v3899_v52 = vpop.eup %3898 }
0x1443   :  { %v3901_v5 = vpop.eup %3900 }
0x1444   :  { %v3251_v30 = vmul.f32 %v3901_v5, %v3899_v52 }
0x1446   :  { %3715 = vmatmul.mubr.msk.f32.vlgmr.msra.gmra.mrb[24].mxu0 %vm312_vm2, %v3251_v30 }
0x1519   :  { %v3321_v54 = vpop.f32.mrb[24].mxu0 }
0x151a   :  { %v3322_v58 = vadd.f32 %v3918_v8, %v3321_v54  ;;  %v3716_v38 = vpop.f32.mrb[25].mxu0 }
0x151c   :  { %v3327_v55 = vadd.f32 %v3449_v7, %v3322_v58 }
0x151e   :  { %v3328_v11 = vsel %vm1367_vm10, %v3327_v55, -inf }
0x151f   :  { %3329 = vmax.xlane.f32.xlu0 %v3328_v11 }
0x15ac   :  { %v3330_v49 = vpop.xlane.xlu0 %3329 }
0x15ad   :  { %v3331_v57 = vsub.f32 %v3327_v55, %v3330_v49 }
0x15af   :  { %v3332_v44 = vmul.f32 1.442695, %v3331_v57  ;;  %vm3339_vm0 = vcmp.eq.f32.partialorder %v3331_v57, 0.0 }
0x15b0   :  { %v3450_v14 = vsel %vm3339_vm0, 1.0, %v4043_v1 }
0x15b1   :  { %3902 = vpow2.f32 %v3332_v44 }
0x15bb   :  { %v3903_v10 = vpop.eup %3902 }
0x15bc   :  { %v3334_v13 = vsel %vm1367_vm10, %v3903_v10, 0.0 }
0x15bd   :  { %3335 = vadd.xlane.f32.xlu1 %v3334_v13 }
0x164a   :  { %v3336_v26 = vpop.xlane.xlu1 %3335 }
0x164b   :  { %3904 = vrcp.f32 %v3336_v26 }
0x1655   :  { %v3905_v31 = vpop.eup %3904 }
0x1656   :  { %v3338_v15 = vmul.f32 %v3905_v31, %v3903_v10 }
0x1658   :  { %v3342_v16 = vsub.f32 %v3450_v14, %v3338_v15 }
0x165a   :  { %v3343_v22 = vadd.f32 %v3342_v16, %v3338_v15 }
0x165c   :  { %3346 = vst.msk [vmem:[#allocation10 + $0x8] sm:$0xf] %vm1367_vm10, %v3343_v22 }
0x165d   :  { %4018 = shalt.err (!%p4015_p8)
}
0x165e   :  { %s4019_s5 = scalar_lea.hbm %s4880_s20, 192 }
0x165f   :  { %p4020_p9 = scmp.ne.s32.totalorder %s4880_s20, %s4019_s5  ;;  %p4023_p10 = scmp.lt.u32.totalorder %s4019_s5, %s4880_s20 }
0x1661   :  { %p4025_p11 = pnand %p4023_p10, %p4020_p9 }
0x1663   :  { %4028 = shalt.err (!%p4025_p11)
}
0x1664   :  { %s4056_s21 = smov 64  }
0x1665   :  { %3358 = dma.vmem_to_hbm [thread:$0]  %s3353_s4, 192, %s4880_s20, [#allocation4], %s4056_s21, %s4056_s21, %s4053_s10  }
0x1666   :  { %4035 = dma.done.wait [#allocation4], 192  }
0x1667   :  { %4036 = vsyncadd [#allocation4], 4294967104 }
0x1668   :  { %3362 = vsyncpa [#allocation3], 1 }
0x1669   :  { %3363 = vsyncpa [#allocation6], 1 }
0x166a   :  { %3364 = vsyncpa [#allocation9], 1 }
0x166b   :  { %3365 = vsyncpa [#allocation4], 1 }

</bundles_post_ra>
